<compile_context>
chip_gen: v7x
topology: tpu7x:2x2x1
jax: 0.10.0
libtpu: 0.0.40
codegen_flags: <defaults>
</compile_context>

<pallas_src>
import functools

import jax
import jax.numpy as jnp
import numpy as np
from jax.experimental import pallas as pl
from jax.experimental.pallas import tpu as pltpu

LN_EPS = 1e-5       # torch.nn.LayerNorm default
LANE = 128          # TPU lane width
N_COND_ROWS = 12    # precomputed conditioning vectors packed as slab rows


def _silu(x):
    return x * jax.nn.sigmoid(x)


def _layernorm(x):
    # LayerNorm with elementwise_affine=False (biased variance, eps=1e-5), f32.
    mu = jnp.mean(x, axis=-1, keepdims=True)
    var = jnp.mean(jnp.square(x - mu), axis=-1, keepdims=True)
    return (x - mu) * jax.lax.rsqrt(var + LN_EPS)


def _round_up(n, m=LANE):
    return ((n + m - 1) // m) * m


def _pad_lanes(x, width):
    pad = width - x.shape[-1]
    if pad == 0:
        return x
    return jnp.concatenate([x, jnp.zeros((x.shape[0], pad), x.dtype)], axis=-1)


# ---------------------------------------------------------------------------
# Pallas kernel: one batch element per grid step.
#
# Input slab rows (all f32, 128 lanes, valid width in brackets):
#   [0, Na)            xa tokens                     [Da]
#   [Na, Na+Nb)        xb tokens                     [Db]
#   Na+Nb + 0..3       attn_gamma_a/b, ff_gamma_a/b  [Da/Db]
#   Na+Nb + 4..7       AdaLN(attn): g_a, b_a, g_b, b_b
#   Na+Nb + 8..11      AdaLN(ff):   g_a, b_a, g_b, b_b
# ---------------------------------------------------------------------------
def mmdit_block_kernel(in_ref,
                       wqkv_a_ref, wqkv_b_ref, wout_a_ref, wout_b_ref,
                       w1a_ref, w2a_ref, w1b_ref, w2b_ref, bff_ref,
                       o_ref,
                       *, heads, dim_head, na, nb, da, db):
    f32, bf16 = jnp.float32, jnp.bfloat16
    hd = heads * dim_head

    slab = in_ref[0]                       # (na+nb+12, 128) f32, single dense load
    xa = slab[0:na, 0:da]
    xb = slab[na:na + nb, 0:db]
    cb = na + nb

    def cvec(i, w):                        # conditioning row i -> (1, w)
        return slab[cb + i:cb + i + 1, 0:w]

    attn_g_a, attn_g_b = cvec(0, da), cvec(1, db)
    ff_g_a, ff_g_b = cvec(2, da), cvec(3, db)

    def adaln(x, gi, w):
        return _layernorm(x) * cvec(gi, w) + cvec(gi + 1, w)

    # ---------------- joint attention branch ----------------
    ha = adaln(xa, 4, da).astype(bf16)     # (na, da)
    hb = adaln(xb, 6, db).astype(bf16)     # (nb, db)

    # one fused QKV matmul per modality (softmax scale pre-folded into q cols)
    qkv_a = jnp.dot(ha, wqkv_a_ref[...], preferred_element_type=f32)   # (na, 3*hd)
    qkv_b = jnp.dot(hb, wqkv_b_ref[...], preferred_element_type=f32)   # (nb, 3*hd)
    qkv = jnp.concatenate([qkv_a, qkv_b], axis=0).astype(bf16)         # (n, 3*hd)
    q = qkv[:, 0:hd]
    k = qkv[:, hd:2 * hd]
    v = qkv[:, 2 * hd:3 * hd]

    o_heads = []
    # TODO(synk): switch to lax.fori_loop / a head grid axis at large head counts.
    for h in range(heads):
        sl = slice(h * dim_head, (h + 1) * dim_head)
        qh, kh, vh = q[:, sl], k[:, sl], v[:, sl]
        sim = jax.lax.dot_general(qh, kh, (((1,), (1,)), ((), ())),
                                  preferred_element_type=f32)          # (n, n)
        # numerically-stable softmax; divide -> EUP reciprocal
        m = jnp.max(sim, axis=-1, keepdims=True)
        p = jnp.exp(sim - m)
        p = p * pl.reciprocal(jnp.sum(p, axis=-1, keepdims=True), approx=True)
        oh = jnp.dot(p.astype(bf16), vh, preferred_element_type=f32)   # (n, dh)
        o_heads.append(oh)
    o_all = jnp.concatenate(o_heads, axis=-1)                          # (n, hd) f32

    # one fused output projection per modality
    attn_a = jnp.dot(o_all[0:na].astype(bf16), wout_a_ref[...],
                     preferred_element_type=f32)                       # (na, da)
    attn_b = jnp.dot(o_all[na:].astype(bf16), wout_b_ref[...],
                     preferred_element_type=f32)                       # (nb, db)

    xa1 = attn_a * attn_g_a + xa
    xb1 = attn_b * attn_g_b + xb

    # ---------------- feedforward branch ----------------
    bff = bff_ref[...]                     # (4, >=128) f32 bias rows
    hfa = w1a_ref.shape[1]
    hfb = w1b_ref.shape[1]

    def gelu(x):
        return jax.nn.gelu(x, approximate=True)   # tanh-approx on EUP

    fa = adaln(xa1, 8, da).astype(bf16)
    h1 = jnp.dot(fa, w1a_ref[...], preferred_element_type=f32) + bff[0:1, 0:hfa]
    h1 = gelu(h1).astype(bf16)
    ya = jnp.dot(h1, w2a_ref[...], preferred_element_type=f32) + bff[1:2, 0:da]
    ya = ya * ff_g_a + xa1

    fb = adaln(xb1, 10, db).astype(bf16)
    h2 = jnp.dot(fb, w1b_ref[...], preferred_element_type=f32) + bff[2:3, 0:hfb]
    h2 = gelu(h2).astype(bf16)
    yb = jnp.dot(h2, w2b_ref[...], preferred_element_type=f32) + bff[3:4, 0:db]
    yb = yb * ff_g_b + xb1

    # ---------------- lane-dense epilogue: one unmasked full-lane store ----------------
    out = jnp.concatenate([_pad_lanes(ya, LANE), _pad_lanes(yb, LANE)], axis=0)
    o_ref[0] = out.astype(o_ref.dtype)


# ---------------------------------------------------------------------------
# Wrapper: weight prep, cond precompute, slab packing, pallas_call.
# ---------------------------------------------------------------------------
WEIGHT_ORDER = ['wqkv_a', 'wqkv_b', 'wout_a', 'wout_b',
                'w1a', 'w2a', 'w1b', 'w2b', 'b_ff']


def _prep_weights(P, *, heads, dim_head):
    bf16 = jnp.bfloat16
    hd = heads * dim_head
    scale = dim_head ** -0.5
    Da = P['wqkv_a'].shape[0]
    Db = P['wqkv_b'].shape[0]
    Hfa = P['w1a'].shape[1]
    Hfb = P['w1b'].shape[1]

    # torch qkv column order is (q|k|v, heads, dim_head) -> already the fused
    # layout the kernel wants; fold the softmax scale into the q columns.
    wqkv_a = P['wqkv_a'].at[:, :hd].multiply(scale).astype(bf16)
    wqkv_b = P['wqkv_b'].at[:, :hd].multiply(scale).astype(bf16)

    bw = _round_up(max(Hfa, Hfb, Da, Db))
    bff = jnp.zeros((4, bw), jnp.float32)
    bff = bff.at[0, :Hfa].set(P['b1a'][0])
    bff = bff.at[1, :Da].set(P['b2a'][0])
    bff = bff.at[2, :Hfb].set(P['b1b'][0])
    bff = bff.at[3, :Db].set(P['b2b'][0])

    return dict(
        wqkv_a=wqkv_a, wqkv_b=wqkv_b,
        wout_a=P['wout_a'].astype(bf16), wout_b=P['wout_b'].astype(bf16),
        w1a=P['w1a'].astype(bf16), w2a=P['w2a'].astype(bf16),
        w1b=P['w1b'].astype(bf16), w2b=P['w2b'].astype(bf16),
        b_ff=bff,
    )


def _build_input_slab(xa, xb, cond, P):
    """Pack activations + precomputed conditioning rows into one lane-dense
    f32 (B, Na+Nb+12, 128) slab -> a single wide DMA per grid step."""
    B, Na, Da = xa.shape
    _, Nb, Db = xb.shape
    S = Da + Db
    f32 = jnp.float32

    # Tiny conditioning linears hoisted out of the kernel (f32, exact).
    c = _silu(cond.astype(f32))                              # (B, dc)
    pg = c @ P['wpg'] + P['bpg']                             # (B, 2S)
    aa = c @ P['w_aln_attn_a'] + P['b_aln_attn_a']           # (B, 2Da)
    ab = c @ P['w_aln_attn_b'] + P['b_aln_attn_b']           # (B, 2Db)
    fa = c @ P['w_aln_ff_a'] + P['b_aln_ff_a']               # (B, 2Da)
    fb = c @ P['w_aln_ff_b'] + P['b_aln_ff_b']               # (B, 2Db)

    R = Na + Nb + N_COND_ROWS
    slab = jnp.zeros((B, R, LANE), f32)
    slab = slab.at[:, 0:Na, 0:Da].set(xa.astype(f32))
    slab = slab.at[:, Na:Na + Nb, 0:Db].set(xb.astype(f32))
    cb = Na + Nb
    rows = [
        pg[:, 0:Da], pg[:, Da:S], pg[:, S:S + Da], pg[:, S + Da:2 * S],
        aa[:, 0:Da], aa[:, Da:], ab[:, 0:Db], ab[:, Db:],
        fa[:, 0:Da], fa[:, Da:], fb[:, 0:Db], fb[:, Db:],
    ]
    for i, r in enumerate(rows):
        slab = slab.at[:, cb + i, 0:r.shape[-1]].set(r)
    return slab


def mmdit_block(xa, xb, cond, params, *, heads, dim_head):
    B, Na, Da = xa.shape
    _, Nb, Db = xb.shape
    Ntot = Na + Nb
    R = Ntot + N_COND_ROWS

    slab = _build_input_slab(xa, xb, cond, params)
    W = _prep_weights(params, heads=heads, dim_head=dim_head)
    weights = [W[n] for n in WEIGHT_ORDER]

    def full_spec(arr):
        nd = arr.ndim
        # constant block index -> fetched once, not re-DMA'd across grid steps
        return pl.BlockSpec(arr.shape, lambda b, nd=nd: (0,) * nd)

    in_specs = [pl.BlockSpec((1, R, LANE), lambda b: (b, 0, 0))] + \
               [full_spec(w) for w in weights]
    out_specs = pl.BlockSpec((1, Ntot, LANE), lambda b: (b, 0, 0))
    out_shape = jax.ShapeDtypeStruct((B, Ntot, LANE), jnp.float32)

    kernel = functools.partial(mmdit_block_kernel, heads=heads, dim_head=dim_head,
                               na=Na, nb=Nb, da=Da, db=Db)

    out_slab = pl.pallas_call(
        kernel,
        out_shape=out_shape,
        grid_spec=pltpu.PrefetchScalarGridSpec(
            num_scalar_prefetch=0,
            grid=(B,),
            in_specs=in_specs,
            out_specs=out_specs,
        ),
        compiler_params=pltpu.CompilerParams(
            dimension_semantics=("parallel",),   # independent batch steps -> megacore
            vmem_limit_bytes=32 * 1024 * 1024,
        ),
    )(slab, *weights)

    out_a = out_slab[:, 0:Na, 0:Da].astype(xa.dtype)
    out_b = out_slab[:, Na:Ntot, 0:Db].astype(xb.dtype)
    return out_a, out_b


# ---------------------------------------------------------------------------
# Pure-JAX reference (mirrors the PyTorch forward exactly, f32, exact erf GELU).
# ---------------------------------------------------------------------------
def mmdit_block_ref(xa, xb, cond, P, *, heads, dim_head):
    Da, Db = xa.shape[-1], xb.shape[-1]
    S = Da + Db
    hd = heads * dim_head
    c = _silu(cond)[:, None, :]  # (B,1,dc)

    def lin(x, w, b=None):
        y = jnp.einsum('...i,io->...o', x, w)
        return y if b is None else y + b

    pg = lin(c, P['wpg'], P['bpg'])
    attn_g_a, attn_g_b = pg[..., :Da], pg[..., Da:S]
    ff_g_a, ff_g_b = pg[..., S:S + Da], pg[..., S + Da:]

    def adaln(x, w, b, D):
        gb = lin(c, w, b)
        return _layernorm(x) * gb[..., :D] + gb[..., D:]

    ha = adaln(xa, P['w_aln_attn_a'], P['b_aln_attn_a'], Da)
    hb = adaln(xb, P['w_aln_attn_b'], P['b_aln_attn_b'], Db)

    def split_heads(t):  # 'b n (qkv h d) -> qkv b h n d'
        B, N, _ = t.shape
        return t.reshape(B, N, 3, heads, dim_head).transpose(2, 0, 3, 1, 4)

    qa, ka, va = split_heads(lin(ha, P['wqkv_a']))
    qb, kb, vb = split_heads(lin(hb, P['wqkv_b']))
    q = jnp.concatenate([qa, qb], axis=2)
    k = jnp.concatenate([ka, kb], axis=2)
    v = jnp.concatenate([va, vb], axis=2)

    sim = jnp.einsum('bhnd,bhmd->bhnm', q * (dim_head ** -0.5), k)
    p = jax.nn.softmax(sim, axis=-1)
    o = jnp.einsum('bhnm,bhmd->bhnd', p, v)
    o = o.transpose(0, 2, 1, 3).reshape(o.shape[0], -1, hd)  # 'b h n d -> b n (h d)'

    Na = xa.shape[1]
    attn_a = lin(o[:, :Na], P['wout_a'])
    attn_b = lin(o[:, Na:], P['wout_b'])
    xa1 = attn_a * attn_g_a + xa
    xb1 = attn_b * attn_g_b + xb

    fa = adaln(xa1, P['w_aln_ff_a'], P['b_aln_ff_a'], Da)
    fb = adaln(xb1, P['w_aln_ff_b'], P['b_aln_ff_b'], Db)
    fa = lin(jax.nn.gelu(lin(fa, P['w1a'], P['b1a']), approximate=False), P['w2a'], P['b2a'])
    fb = lin(jax.nn.gelu(lin(fb, P['w1b'], P['b1b']), approximate=False), P['w2b'], P['b2b'])

    ya = fa * ff_g_a + xa1
    yb = fb * ff_g_b + xb1
    return ya, yb


def init_params(key, *, dims, dim_cond, heads, dim_head, ff_mult=4):
    Da, Db = dims
    hd = heads * dim_head
    S = Da + Db
    shapes = dict(
        wpg=(dim_cond, 2 * S), bpg=(1, 2 * S),
        w_aln_attn_a=(dim_cond, 2 * Da), b_aln_attn_a=(1, 2 * Da),
        w_aln_attn_b=(dim_cond, 2 * Db), b_aln_attn_b=(1, 2 * Db),
        wqkv_a=(Da, 3 * hd), wqkv_b=(Db, 3 * hd),
        wout_a=(hd, Da), wout_b=(hd, Db),
        w_aln_ff_a=(dim_cond, 2 * Da), b_aln_ff_a=(1, 2 * Da),
        w_aln_ff_b=(dim_cond, 2 * Db), b_aln_ff_b=(1, 2 * Db),
        w1a=(Da, ff_mult * Da), b1a=(1, ff_mult * Da),
        w2a=(ff_mult * Da, Da), b2a=(1, Da),
        w1b=(Db, ff_mult * Db), b1b=(1, ff_mult * Db),
        w2b=(ff_mult * Db, Db), b2b=(1, Db),
    )
    params = {}
    keys = jax.random.split(key, len(shapes))
    for k_, (name, shp) in zip(keys, sorted(shapes.items())):
        params[name] = (0.05 * jax.random.normal(k_, shp)).astype(jnp.float32)
    return params


if __name__ == "__main__":
    B = 2
    dims = (32, 16)      # dim_modalities (e.g. text, image)
    seqs = (8, 16)       # tokens per modality
    dim_cond = 8
    heads, dim_head = 4, 16   # attention inner dim = 64

    key = jax.random.PRNGKey(0)
    k1, k2, k3, k4 = jax.random.split(key, 4)
    xa = jax.random.normal(k1, (B, seqs[0], dims[0]), dtype=jnp.float32)
    xb = jax.random.normal(k2, (B, seqs[1], dims[1]), dtype=jnp.float32)
    cond = jax.random.normal(k3, (B, dim_cond), dtype=jnp.float32)
    params = init_params(k4, dims=dims, dim_cond=dim_cond, heads=heads, dim_head=dim_head)

    out_a, out_b = mmdit_block(xa, xb, cond, params, heads=heads, dim_head=dim_head)
    jax.block_until_ready((out_a, out_b))

    ref_a, ref_b = mmdit_block_ref(xa, xb, cond, params, heads=heads, dim_head=dim_head)

    assert out_a.shape == xa.shape and out_b.shape == xb.shape
    # tolerance absorbs bf16 MXU operands + tanh-approx GELU + approx reciprocal
    assert np.allclose(np.asarray(out_a), np.asarray(ref_a), atol=2e-2, rtol=2e-2)
    assert np.allclose(np.asarray(out_b), np.asarray(ref_b), atol=2e-2, rtol=2e-2)
    print("KERNEL_OK")
</pallas_src>

<mosaic_0001>
module attributes {stable_mosaic.version = 11 : i64} {
  func.func @mmdit_block_kernel(%arg0: i32, %arg1: memref<1x36x128xf32, #tpu.memory_space<vmem>>, %arg2: memref<32x192xbf16, #tpu.memory_space<vmem>>, %arg3: memref<16x192xbf16, #tpu.memory_space<vmem>>, %arg4: memref<64x32xbf16, #tpu.memory_space<vmem>>, %arg5: memref<64x16xbf16, #tpu.memory_space<vmem>>, %arg6: memref<32x128xbf16, #tpu.memory_space<vmem>>, %arg7: memref<128x32xbf16, #tpu.memory_space<vmem>>, %arg8: memref<16x64xbf16, #tpu.memory_space<vmem>>, %arg9: memref<64x16xbf16, #tpu.memory_space<vmem>>, %arg10: memref<4x128xf32, #tpu.memory_space<vmem>>, %arg11: memref<1x24x128xf32, #tpu.memory_space<vmem>>) attributes {dimension_semantics = [#tpu.dimension_semantics<parallel>], iteration_bounds = array<i64: 2>, scalar_prefetch = 0 : i64, scratch_operands = 0 : i64, tpu.core_type = #tpu.core_type<tc>, window_params = [{transform_indices = @transform_0, window_bounds = array<i64: 1, 36, 128>}, {pipeline_mode = #tpu.pipeline_mode<synchronous>, transform_indices = @transform_1, window_bounds = array<i64: 32, 192>}, {pipeline_mode = #tpu.pipeline_mode<synchronous>, transform_indices = @transform_2, window_bounds = array<i64: 16, 192>}, {pipeline_mode = #tpu.pipeline_mode<synchronous>, transform_indices = @transform_3, window_bounds = array<i64: 64, 32>}, {pipeline_mode = #tpu.pipeline_mode<synchronous>, transform_indices = @transform_4, window_bounds = array<i64: 64, 16>}, {pipeline_mode = #tpu.pipeline_mode<synchronous>, transform_indices = @transform_5, window_bounds = array<i64: 32, 128>}, {pipeline_mode = #tpu.pipeline_mode<synchronous>, transform_indices = @transform_6, window_bounds = array<i64: 128, 32>}, {pipeline_mode = #tpu.pipeline_mode<synchronous>, transform_indices = @transform_7, window_bounds = array<i64: 16, 64>}, {pipeline_mode = #tpu.pipeline_mode<synchronous>, transform_indices = @transform_8, window_bounds = array<i64: 64, 16>}, {pipeline_mode = #tpu.pipeline_mode<synchronous>, transform_indices = @transform_9, window_bounds = array<i64: 4, 128>}, {transform_indices = @transform_10, window_bounds = array<i64: 1, 24, 128>}]} {
    %c0 = arith.constant 0 : index
    %c0_0 = arith.constant 0 : index
    %c0_1 = arith.constant 0 : index
    %0 = vector.load %arg1[%c0, %c0_0, %c0_1] : memref<1x36x128xf32, #tpu.memory_space<vmem>>, vector<1x36x128xf32>
    %1 = vector.shape_cast %0 : vector<1x36x128xf32> to vector<36x128xf32>
    %2 = vector.extract_strided_slice %1 {offsets = [0, 0], sizes = [8, 32], strides = [1, 1]} : vector<36x128xf32> to vector<8x32xf32>
    %3 = vector.extract_strided_slice %1 {offsets = [8, 0], sizes = [16, 16], strides = [1, 1]} : vector<36x128xf32> to vector<16x16xf32>
    %4 = vector.extract_strided_slice %1 {offsets = [24, 0], sizes = [1, 32], strides = [1, 1]} : vector<36x128xf32> to vector<1x32xf32>
    %5 = vector.extract_strided_slice %1 {offsets = [25, 0], sizes = [1, 16], strides = [1, 1]} : vector<36x128xf32> to vector<1x16xf32>
    %6 = vector.extract_strided_slice %1 {offsets = [26, 0], sizes = [1, 32], strides = [1, 1]} : vector<36x128xf32> to vector<1x32xf32>
    %7 = vector.extract_strided_slice %1 {offsets = [27, 0], sizes = [1, 16], strides = [1, 1]} : vector<36x128xf32> to vector<1x16xf32>
    %cst = arith.constant dense<0.000000e+00> : vector<8xf32>
    %8 = vector.multi_reduction <add>, %2, %cst [1] : vector<8x32xf32> to vector<8xf32>
    %9 = vector.shape_cast %8 : vector<8xf32> to vector<8x1xf32>
    %cst_2 = arith.constant 3.200000e+01 : f32
    %10 = vector.broadcast %cst_2 : f32 to vector<8x1xf32>
    %11 = arith.divf %9, %10 : vector<8x1xf32>
    %12 = vector.broadcast %11 : vector<8x1xf32> to vector<8x32xf32>
    %13 = arith.subf %2, %12 : vector<8x32xf32>
    %14 = arith.mulf %13, %13 : vector<8x32xf32>
    %cst_3 = arith.constant dense<0.000000e+00> : vector<8xf32>
    %15 = vector.multi_reduction <add>, %14, %cst_3 [1] : vector<8x32xf32> to vector<8xf32>
    %16 = vector.shape_cast %15 : vector<8xf32> to vector<8x1xf32>
    %cst_4 = arith.constant 3.200000e+01 : f32
    %17 = vector.broadcast %cst_4 : f32 to vector<8x1xf32>
    %18 = arith.divf %16, %17 : vector<8x1xf32>
    %19 = vector.broadcast %11 : vector<8x1xf32> to vector<8x32xf32>
    %20 = arith.subf %2, %19 : vector<8x32xf32>
    %cst_5 = arith.constant 9.99999974E-6 : f32
    %21 = vector.broadcast %cst_5 : f32 to vector<8x1xf32>
    %22 = arith.addf %18, %21 : vector<8x1xf32>
    %23 = math.rsqrt %22 : vector<8x1xf32>
    %24 = vector.broadcast %23 : vector<8x1xf32> to vector<8x32xf32>
    %25 = arith.mulf %20, %24 : vector<8x32xf32>
    %26 = vector.extract_strided_slice %1 {offsets = [28, 0], sizes = [1, 32], strides = [1, 1]} : vector<36x128xf32> to vector<1x32xf32>
    %27 = vector.broadcast %26 : vector<1x32xf32> to vector<8x32xf32>
    %28 = arith.mulf %25, %27 : vector<8x32xf32>
    %29 = vector.extract_strided_slice %1 {offsets = [29, 0], sizes = [1, 32], strides = [1, 1]} : vector<36x128xf32> to vector<1x32xf32>
    %30 = vector.broadcast %29 : vector<1x32xf32> to vector<8x32xf32>
    %31 = arith.addf %28, %30 : vector<8x32xf32>
    %32 = arith.truncf %31 : vector<8x32xf32> to vector<8x32xbf16>
    %cst_6 = arith.constant dense<0.000000e+00> : vector<16xf32>
    %33 = vector.multi_reduction <add>, %3, %cst_6 [1] : vector<16x16xf32> to vector<16xf32>
    %34 = vector.shape_cast %33 : vector<16xf32> to vector<16x1xf32>
    %cst_7 = arith.constant 1.600000e+01 : f32
    %35 = vector.broadcast %cst_7 : f32 to vector<16x1xf32>
    %36 = arith.divf %34, %35 : vector<16x1xf32>
    %37 = vector.broadcast %36 : vector<16x1xf32> to vector<16x16xf32>
    %38 = arith.subf %3, %37 : vector<16x16xf32>
    %39 = arith.mulf %38, %38 : vector<16x16xf32>
    %cst_8 = arith.constant dense<0.000000e+00> : vector<16xf32>
    %40 = vector.multi_reduction <add>, %39, %cst_8 [1] : vector<16x16xf32> to vector<16xf32>
    %41 = vector.shape_cast %40 : vector<16xf32> to vector<16x1xf32>
    %cst_9 = arith.constant 1.600000e+01 : f32
    %42 = vector.broadcast %cst_9 : f32 to vector<16x1xf32>
    %43 = arith.divf %41, %42 : vector<16x1xf32>
    %44 = vector.broadcast %36 : vector<16x1xf32> to vector<16x16xf32>
    %45 = arith.subf %3, %44 : vector<16x16xf32>
    %cst_10 = arith.constant 9.99999974E-6 : f32
    %46 = vector.broadcast %cst_10 : f32 to vector<16x1xf32>
    %47 = arith.addf %43, %46 : vector<16x1xf32>
    %48 = math.rsqrt %47 : vector<16x1xf32>
    %49 = vector.broadcast %48 : vector<16x1xf32> to vector<16x16xf32>
    %50 = arith.mulf %45, %49 : vector<16x16xf32>
    %51 = vector.extract_strided_slice %1 {offsets = [30, 0], sizes = [1, 16], strides = [1, 1]} : vector<36x128xf32> to vector<1x16xf32>
    %52 = vector.broadcast %51 : vector<1x16xf32> to vector<16x16xf32>
    %53 = arith.mulf %50, %52 : vector<16x16xf32>
    %54 = vector.extract_strided_slice %1 {offsets = [31, 0], sizes = [1, 16], strides = [1, 1]} : vector<36x128xf32> to vector<1x16xf32>
    %55 = vector.broadcast %54 : vector<1x16xf32> to vector<16x16xf32>
    %56 = arith.addf %53, %55 : vector<16x16xf32>
    %57 = arith.truncf %56 : vector<16x16xf32> to vector<16x16xbf16>
    %c0_11 = arith.constant 0 : index
    %c0_12 = arith.constant 0 : index
    %58 = vector.load %arg2[%c0_11, %c0_12] : memref<32x192xbf16, #tpu.memory_space<vmem>>, vector<32x192xbf16>
    %cst_13 = arith.constant dense<0.000000e+00> : vector<8x192xf32>
    %59 = tpu.matmul %32, %58, %cst_13 {dimension_numbers = #tpu.dot_dimension_numbers<[1], [0], [0], [1], [0, 0, 1, 1], [], []>} : vector<8x32xbf16>, vector<32x192xbf16>, vector<8x192xf32> -> vector<8x192xf32>
    %c0_14 = arith.constant 0 : index
    %c0_15 = arith.constant 0 : index
    %60 = vector.load %arg3[%c0_14, %c0_15] : memref<16x192xbf16, #tpu.memory_space<vmem>>, vector<16x192xbf16>
    %cst_16 = arith.constant dense<0.000000e+00> : vector<16x192xf32>
    %61 = tpu.matmul %57, %60, %cst_16 {dimension_numbers = #tpu.dot_dimension_numbers<[1], [0], [0], [1], [0, 0, 1, 1], [], []>} : vector<16x16xbf16>, vector<16x192xbf16>, vector<16x192xf32> -> vector<16x192xf32>
    %62 = tpu.concatenate %59, %61 in 0 : vector<8x192xf32>, vector<16x192xf32> -> vector<24x192xf32>
    %63 = arith.truncf %62 : vector<24x192xf32> to vector<24x192xbf16>
    %64 = vector.extract_strided_slice %63 {offsets = [0, 0], sizes = [24, 64], strides = [1, 1]} : vector<24x192xbf16> to vector<24x64xbf16>
    %65 = vector.extract_strided_slice %63 {offsets = [0, 64], sizes = [24, 64], strides = [1, 1]} : vector<24x192xbf16> to vector<24x64xbf16>
    %66 = vector.extract_strided_slice %63 {offsets = [0, 128], sizes = [24, 64], strides = [1, 1]} : vector<24x192xbf16> to vector<24x64xbf16>
    %67 = vector.extract_strided_slice %64 {offsets = [0, 0], sizes = [24, 16], strides = [1, 1]} : vector<24x64xbf16> to vector<24x16xbf16>
    %68 = vector.extract_strided_slice %65 {offsets = [0, 0], sizes = [24, 16], strides = [1, 1]} : vector<24x64xbf16> to vector<24x16xbf16>
    %69 = vector.extract_strided_slice %66 {offsets = [0, 0], sizes = [24, 16], strides = [1, 1]} : vector<24x64xbf16> to vector<24x16xbf16>
    %cst_17 = arith.constant dense<0.000000e+00> : vector<24x24xf32>
    %70 = tpu.matmul %67, %68, %cst_17 {dimension_numbers = #tpu.dot_dimension_numbers<[1], [1], [0], [0], [0, 0, 1, 0], [], []>} : vector<24x16xbf16>, vector<24x16xbf16>, vector<24x24xf32> -> vector<24x24xf32>
    %cst_18 = arith.constant dense<0xFF800000> : vector<24xf32>
    %71 = vector.multi_reduction <maximumf>, %70, %cst_18 [1] : vector<24x24xf32> to vector<24xf32>
    %72 = vector.shape_cast %71 : vector<24xf32> to vector<24x1xf32>
    %73 = vector.broadcast %72 : vector<24x1xf32> to vector<24x24xf32>
    %74 = arith.subf %70, %73 : vector<24x24xf32>
    %75 = math.exp %74 : vector<24x24xf32>
    %cst_19 = arith.constant dense<0.000000e+00> : vector<24xf32>
    %76 = vector.multi_reduction <add>, %75, %cst_19 [1] : vector<24x24xf32> to vector<24xf32>
    %77 = vector.shape_cast %76 : vector<24xf32> to vector<24x1xf32>
    %78 = tpu.reciprocal %77 {approx = true} : vector<24x1xf32> -> vector<24x1xf32>
    %79 = vector.broadcast %78 : vector<24x1xf32> to vector<24x24xf32>
    %80 = arith.mulf %75, %79 : vector<24x24xf32>
    %81 = arith.truncf %80 : vector<24x24xf32> to vector<24x24xbf16>
    %cst_20 = arith.constant dense<0.000000e+00> : vector<24x16xf32>
    %82 = tpu.matmul %81, %69, %cst_20 {dimension_numbers = #tpu.dot_dimension_numbers<[1], [0], [0], [1], [0, 0, 1, 1], [], []>} : vector<24x24xbf16>, vector<24x16xbf16>, vector<24x16xf32> -> vector<24x16xf32>
    %83 = vector.extract_strided_slice %64 {offsets = [0, 16], sizes = [24, 16], strides = [1, 1]} : vector<24x64xbf16> to vector<24x16xbf16>
    %84 = vector.extract_strided_slice %65 {offsets = [0, 16], sizes = [24, 16], strides = [1, 1]} : vector<24x64xbf16> to vector<24x16xbf16>
    %85 = vector.extract_strided_slice %66 {offsets = [0, 16], sizes = [24, 16], strides = [1, 1]} : vector<24x64xbf16> to vector<24x16xbf16>
    %cst_21 = arith.constant dense<0.000000e+00> : vector<24x24xf32>
    %86 = tpu.matmul %83, %84, %cst_21 {dimension_numbers = #tpu.dot_dimension_numbers<[1], [1], [0], [0], [0, 0, 1, 0], [], []>} : vector<24x16xbf16>, vector<24x16xbf16>, vector<24x24xf32> -> vector<24x24xf32>
    %cst_22 = arith.constant dense<0xFF800000> : vector<24xf32>
    %87 = vector.multi_reduction <maximumf>, %86, %cst_22 [1] : vector<24x24xf32> to vector<24xf32>
    %88 = vector.shape_cast %87 : vector<24xf32> to vector<24x1xf32>
    %89 = vector.broadcast %88 : vector<24x1xf32> to vector<24x24xf32>
    %90 = arith.subf %86, %89 : vector<24x24xf32>
    %91 = math.exp %90 : vector<24x24xf32>
    %cst_23 = arith.constant dense<0.000000e+00> : vector<24xf32>
    %92 = vector.multi_reduction <add>, %91, %cst_23 [1] : vector<24x24xf32> to vector<24xf32>
    %93 = vector.shape_cast %92 : vector<24xf32> to vector<24x1xf32>
    %94 = tpu.reciprocal %93 {approx = true} : vector<24x1xf32> -> vector<24x1xf32>
    %95 = vector.broadcast %94 : vector<24x1xf32> to vector<24x24xf32>
    %96 = arith.mulf %91, %95 : vector<24x24xf32>
    %97 = arith.truncf %96 : vector<24x24xf32> to vector<24x24xbf16>
    %cst_24 = arith.constant dense<0.000000e+00> : vector<24x16xf32>
    %98 = tpu.matmul %97, %85, %cst_24 {dimension_numbers = #tpu.dot_dimension_numbers<[1], [0], [0], [1], [0, 0, 1, 1], [], []>} : vector<24x24xbf16>, vector<24x16xbf16>, vector<24x16xf32> -> vector<24x16xf32>
    %99 = vector.extract_strided_slice %64 {offsets = [0, 32], sizes = [24, 16], strides = [1, 1]} : vector<24x64xbf16> to vector<24x16xbf16>
    %100 = vector.extract_strided_slice %65 {offsets = [0, 32], sizes = [24, 16], strides = [1, 1]} : vector<24x64xbf16> to vector<24x16xbf16>
    %101 = vector.extract_strided_slice %66 {offsets = [0, 32], sizes = [24, 16], strides = [1, 1]} : vector<24x64xbf16> to vector<24x16xbf16>
    %cst_25 = arith.constant dense<0.000000e+00> : vector<24x24xf32>
    %102 = tpu.matmul %99, %100, %cst_25 {dimension_numbers = #tpu.dot_dimension_numbers<[1], [1], [0], [0], [0, 0, 1, 0], [], []>} : vector<24x16xbf16>, vector<24x16xbf16>, vector<24x24xf32> -> vector<24x24xf32>
    %cst_26 = arith.constant dense<0xFF800000> : vector<24xf32>
    %103 = vector.multi_reduction <maximumf>, %102, %cst_26 [1] : vector<24x24xf32> to vector<24xf32>
    %104 = vector.shape_cast %103 : vector<24xf32> to vector<24x1xf32>
    %105 = vector.broadcast %104 : vector<24x1xf32> to vector<24x24xf32>
    %106 = arith.subf %102, %105 : vector<24x24xf32>
    %107 = math.exp %106 : vector<24x24xf32>
    %cst_27 = arith.constant dense<0.000000e+00> : vector<24xf32>
    %108 = vector.multi_reduction <add>, %107, %cst_27 [1] : vector<24x24xf32> to vector<24xf32>
    %109 = vector.shape_cast %108 : vector<24xf32> to vector<24x1xf32>
    %110 = tpu.reciprocal %109 {approx = true} : vector<24x1xf32> -> vector<24x1xf32>
    %111 = vector.broadcast %110 : vector<24x1xf32> to vector<24x24xf32>
    %112 = arith.mulf %107, %111 : vector<24x24xf32>
    %113 = arith.truncf %112 : vector<24x24xf32> to vector<24x24xbf16>
    %cst_28 = arith.constant dense<0.000000e+00> : vector<24x16xf32>
    %114 = tpu.matmul %113, %101, %cst_28 {dimension_numbers = #tpu.dot_dimension_numbers<[1], [0], [0], [1], [0, 0, 1, 1], [], []>} : vector<24x24xbf16>, vector<24x16xbf16>, vector<24x16xf32> -> vector<24x16xf32>
    %115 = vector.extract_strided_slice %64 {offsets = [0, 48], sizes = [24, 16], strides = [1, 1]} : vector<24x64xbf16> to vector<24x16xbf16>
    %116 = vector.extract_strided_slice %65 {offsets = [0, 48], sizes = [24, 16], strides = [1, 1]} : vector<24x64xbf16> to vector<24x16xbf16>
    %117 = vector.extract_strided_slice %66 {offsets = [0, 48], sizes = [24, 16], strides = [1, 1]} : vector<24x64xbf16> to vector<24x16xbf16>
    %cst_29 = arith.constant dense<0.000000e+00> : vector<24x24xf32>
    %118 = tpu.matmul %115, %116, %cst_29 {dimension_numbers = #tpu.dot_dimension_numbers<[1], [1], [0], [0], [0, 0, 1, 0], [], []>} : vector<24x16xbf16>, vector<24x16xbf16>, vector<24x24xf32> -> vector<24x24xf32>
    %cst_30 = arith.constant dense<0xFF800000> : vector<24xf32>
    %119 = vector.multi_reduction <maximumf>, %118, %cst_30 [1] : vector<24x24xf32> to vector<24xf32>
    %120 = vector.shape_cast %119 : vector<24xf32> to vector<24x1xf32>
    %121 = vector.broadcast %120 : vector<24x1xf32> to vector<24x24xf32>
    %122 = arith.subf %118, %121 : vector<24x24xf32>
    %123 = math.exp %122 : vector<24x24xf32>
    %cst_31 = arith.constant dense<0.000000e+00> : vector<24xf32>
    %124 = vector.multi_reduction <add>, %123, %cst_31 [1] : vector<24x24xf32> to vector<24xf32>
    %125 = vector.shape_cast %124 : vector<24xf32> to vector<24x1xf32>
    %126 = tpu.reciprocal %125 {approx = true} : vector<24x1xf32> -> vector<24x1xf32>
    %127 = vector.broadcast %126 : vector<24x1xf32> to vector<24x24xf32>
    %128 = arith.mulf %123, %127 : vector<24x24xf32>
    %129 = arith.truncf %128 : vector<24x24xf32> to vector<24x24xbf16>
    %cst_32 = arith.constant dense<0.000000e+00> : vector<24x16xf32>
    %130 = tpu.matmul %129, %117, %cst_32 {dimension_numbers = #tpu.dot_dimension_numbers<[1], [0], [0], [1], [0, 0, 1, 1], [], []>} : vector<24x24xbf16>, vector<24x16xbf16>, vector<24x16xf32> -> vector<24x16xf32>
    %131 = tpu.concatenate %82, %98, %114, %130 in 1 : vector<24x16xf32>, vector<24x16xf32>, vector<24x16xf32>, vector<24x16xf32> -> vector<24x64xf32>
    %132 = vector.extract_strided_slice %131 {offsets = [0, 0], sizes = [8, 64], strides = [1, 1]} : vector<24x64xf32> to vector<8x64xf32>
    %133 = arith.truncf %132 : vector<8x64xf32> to vector<8x64xbf16>
    %c0_33 = arith.constant 0 : index
    %c0_34 = arith.constant 0 : index
    %134 = vector.load %arg4[%c0_33, %c0_34] : memref<64x32xbf16, #tpu.memory_space<vmem>>, vector<64x32xbf16>
    %cst_35 = arith.constant dense<0.000000e+00> : vector<8x32xf32>
    %135 = tpu.matmul %133, %134, %cst_35 {dimension_numbers = #tpu.dot_dimension_numbers<[1], [0], [0], [1], [0, 0, 1, 1], [], []>} : vector<8x64xbf16>, vector<64x32xbf16>, vector<8x32xf32> -> vector<8x32xf32>
    %136 = vector.extract_strided_slice %131 {offsets = [8, 0], sizes = [16, 64], strides = [1, 1]} : vector<24x64xf32> to vector<16x64xf32>
    %137 = arith.truncf %136 : vector<16x64xf32> to vector<16x64xbf16>
    %c0_36 = arith.constant 0 : index
    %c0_37 = arith.constant 0 : index
    %138 = vector.load %arg5[%c0_36, %c0_37] : memref<64x16xbf16, #tpu.memory_space<vmem>>, vector<64x16xbf16>
    %cst_38 = arith.constant dense<0.000000e+00> : vector<16x16xf32>
    %139 = tpu.matmul %137, %138, %cst_38 {dimension_numbers = #tpu.dot_dimension_numbers<[1], [0], [0], [1], [0, 0, 1, 1], [], []>} : vector<16x64xbf16>, vector<64x16xbf16>, vector<16x16xf32> -> vector<16x16xf32>
    %140 = vector.broadcast %4 : vector<1x32xf32> to vector<8x32xf32>
    %141 = arith.mulf %135, %140 : vector<8x32xf32>
    %142 = arith.addf %141, %2 : vector<8x32xf32>
    %143 = vector.broadcast %5 : vector<1x16xf32> to vector<16x16xf32>
    %144 = arith.mulf %139, %143 : vector<16x16xf32>
    %145 = arith.addf %144, %3 : vector<16x16xf32>
    %c0_39 = arith.constant 0 : index
    %c0_40 = arith.constant 0 : index
    %146 = vector.load %arg10[%c0_39, %c0_40] : memref<4x128xf32, #tpu.memory_space<vmem>>, vector<4x128xf32>
    %cst_41 = arith.constant dense<0.000000e+00> : vector<8xf32>
    %147 = vector.multi_reduction <add>, %142, %cst_41 [1] : vector<8x32xf32> to vector<8xf32>
    %148 = vector.shape_cast %147 : vector<8xf32> to vector<8x1xf32>
    %cst_42 = arith.constant 3.200000e+01 : f32
    %149 = vector.broadcast %cst_42 : f32 to vector<8x1xf32>
    %150 = arith.divf %148, %149 : vector<8x1xf32>
    %151 = vector.broadcast %150 : vector<8x1xf32> to vector<8x32xf32>
    %152 = arith.subf %142, %151 : vector<8x32xf32>
    %153 = arith.mulf %152, %152 : vector<8x32xf32>
    %cst_43 = arith.constant dense<0.000000e+00> : vector<8xf32>
    %154 = vector.multi_reduction <add>, %153, %cst_43 [1] : vector<8x32xf32> to vector<8xf32>
    %155 = vector.shape_cast %154 : vector<8xf32> to vector<8x1xf32>
    %cst_44 = arith.constant 3.200000e+01 : f32
    %156 = vector.broadcast %cst_44 : f32 to vector<8x1xf32>
    %157 = arith.divf %155, %156 : vector<8x1xf32>
    %158 = vector.broadcast %150 : vector<8x1xf32> to vector<8x32xf32>
    %159 = arith.subf %142, %158 : vector<8x32xf32>
    %cst_45 = arith.constant 9.99999974E-6 : f32
    %160 = vector.broadcast %cst_45 : f32 to vector<8x1xf32>
    %161 = arith.addf %157, %160 : vector<8x1xf32>
    %162 = math.rsqrt %161 : vector<8x1xf32>
    %163 = vector.broadcast %162 : vector<8x1xf32> to vector<8x32xf32>
    %164 = arith.mulf %159, %163 : vector<8x32xf32>
    %165 = vector.extract_strided_slice %1 {offsets = [32, 0], sizes = [1, 32], strides = [1, 1]} : vector<36x128xf32> to vector<1x32xf32>
    %166 = vector.broadcast %165 : vector<1x32xf32> to vector<8x32xf32>
    %167 = arith.mulf %164, %166 : vector<8x32xf32>
    %168 = vector.extract_strided_slice %1 {offsets = [33, 0], sizes = [1, 32], strides = [1, 1]} : vector<36x128xf32> to vector<1x32xf32>
    %169 = vector.broadcast %168 : vector<1x32xf32> to vector<8x32xf32>
    %170 = arith.addf %167, %169 : vector<8x32xf32>
    %171 = arith.truncf %170 : vector<8x32xf32> to vector<8x32xbf16>
    %c0_46 = arith.constant 0 : index
    %c0_47 = arith.constant 0 : index
    %172 = vector.load %arg6[%c0_46, %c0_47] : memref<32x128xbf16, #tpu.memory_space<vmem>>, vector<32x128xbf16>
    %cst_48 = arith.constant dense<0.000000e+00> : vector<8x128xf32>
    %173 = tpu.matmul %171, %172, %cst_48 {dimension_numbers = #tpu.dot_dimension_numbers<[1], [0], [0], [1], [0, 0, 1, 1], [], []>} : vector<8x32xbf16>, vector<32x128xbf16>, vector<8x128xf32> -> vector<8x128xf32>
    %174 = vector.extract_strided_slice %146 {offsets = [0, 0], sizes = [1, 128], strides = [1, 1]} : vector<4x128xf32> to vector<1x128xf32>
    %175 = vector.broadcast %174 : vector<1x128xf32> to vector<8x128xf32>
    %176 = arith.addf %173, %175 : vector<8x128xf32>
    %177 = arith.mulf %176, %176 : vector<8x128xf32>
    %178 = arith.mulf %176, %177 : vector<8x128xf32>
    %cst_49 = arith.constant 4.471500e-02 : f32
    %179 = vector.broadcast %cst_49 : f32 to vector<8x128xf32>
    %180 = arith.mulf %179, %178 : vector<8x128xf32>
    %181 = arith.addf %176, %180 : vector<8x128xf32>
    %cst_50 = arith.constant 0.797884583 : f32
    %182 = vector.broadcast %cst_50 : f32 to vector<8x128xf32>
    %183 = arith.mulf %182, %181 : vector<8x128xf32>
    %184 = math.tanh %183 : vector<8x128xf32>
    %cst_51 = arith.constant 1.000000e+00 : f32
    %185 = vector.broadcast %cst_51 : f32 to vector<8x128xf32>
    %186 = arith.addf %185, %184 : vector<8x128xf32>
    %cst_52 = arith.constant 5.000000e-01 : f32
    %187 = vector.broadcast %cst_52 : f32 to vector<8x128xf32>
    %188 = arith.mulf %187, %186 : vector<8x128xf32>
    %189 = arith.mulf %176, %188 : vector<8x128xf32>
    %190 = arith.truncf %189 : vector<8x128xf32> to vector<8x128xbf16>
    %c0_53 = arith.constant 0 : index
    %c0_54 = arith.constant 0 : index
    %191 = vector.load %arg7[%c0_53, %c0_54] : memref<128x32xbf16, #tpu.memory_space<vmem>>, vector<128x32xbf16>
    %cst_55 = arith.constant dense<0.000000e+00> : vector<8x32xf32>
    %192 = tpu.matmul %190, %191, %cst_55 {dimension_numbers = #tpu.dot_dimension_numbers<[1], [0], [0], [1], [0, 0, 1, 1], [], []>} : vector<8x128xbf16>, vector<128x32xbf16>, vector<8x32xf32> -> vector<8x32xf32>
    %193 = vector.extract_strided_slice %146 {offsets = [1, 0], sizes = [1, 32], strides = [1, 1]} : vector<4x128xf32> to vector<1x32xf32>
    %194 = vector.broadcast %193 : vector<1x32xf32> to vector<8x32xf32>
    %195 = arith.addf %192, %194 : vector<8x32xf32>
    %196 = vector.broadcast %6 : vector<1x32xf32> to vector<8x32xf32>
    %197 = arith.mulf %195, %196 : vector<8x32xf32>
    %198 = arith.addf %197, %142 : vector<8x32xf32>
    %cst_56 = arith.constant dense<0.000000e+00> : vector<16xf32>
    %199 = vector.multi_reduction <add>, %145, %cst_56 [1] : vector<16x16xf32> to vector<16xf32>
    %200 = vector.shape_cast %199 : vector<16xf32> to vector<16x1xf32>
    %cst_57 = arith.constant 1.600000e+01 : f32
    %201 = vector.broadcast %cst_57 : f32 to vector<16x1xf32>
    %202 = arith.divf %200, %201 : vector<16x1xf32>
    %203 = vector.broadcast %202 : vector<16x1xf32> to vector<16x16xf32>
    %204 = arith.subf %145, %203 : vector<16x16xf32>
    %205 = arith.mulf %204, %204 : vector<16x16xf32>
    %cst_58 = arith.constant dense<0.000000e+00> : vector<16xf32>
    %206 = vector.multi_reduction <add>, %205, %cst_58 [1] : vector<16x16xf32> to vector<16xf32>
    %207 = vector.shape_cast %206 : vector<16xf32> to vector<16x1xf32>
    %cst_59 = arith.constant 1.600000e+01 : f32
    %208 = vector.broadcast %cst_59 : f32 to vector<16x1xf32>
    %209 = arith.divf %207, %208 : vector<16x1xf32>
    %210 = vector.broadcast %202 : vector<16x1xf32> to vector<16x16xf32>
    %211 = arith.subf %145, %210 : vector<16x16xf32>
    %cst_60 = arith.constant 9.99999974E-6 : f32
    %212 = vector.broadcast %cst_60 : f32 to vector<16x1xf32>
    %213 = arith.addf %209, %212 : vector<16x1xf32>
    %214 = math.rsqrt %213 : vector<16x1xf32>
    %215 = vector.broadcast %214 : vector<16x1xf32> to vector<16x16xf32>
    %216 = arith.mulf %211, %215 : vector<16x16xf32>
    %217 = vector.extract_strided_slice %1 {offsets = [34, 0], sizes = [1, 16], strides = [1, 1]} : vector<36x128xf32> to vector<1x16xf32>
    %218 = vector.broadcast %217 : vector<1x16xf32> to vector<16x16xf32>
    %219 = arith.mulf %216, %218 : vector<16x16xf32>
    %220 = vector.extract_strided_slice %1 {offsets = [35, 0], sizes = [1, 16], strides = [1, 1]} : vector<36x128xf32> to vector<1x16xf32>
    %221 = vector.broadcast %220 : vector<1x16xf32> to vector<16x16xf32>
    %222 = arith.addf %219, %221 : vector<16x16xf32>
    %223 = arith.truncf %222 : vector<16x16xf32> to vector<16x16xbf16>
    %c0_61 = arith.constant 0 : index
    %c0_62 = arith.constant 0 : index
    %224 = vector.load %arg8[%c0_61, %c0_62] : memref<16x64xbf16, #tpu.memory_space<vmem>>, vector<16x64xbf16>
    %cst_63 = arith.constant dense<0.000000e+00> : vector<16x64xf32>
    %225 = tpu.matmul %223, %224, %cst_63 {dimension_numbers = #tpu.dot_dimension_numbers<[1], [0], [0], [1], [0, 0, 1, 1], [], []>} : vector<16x16xbf16>, vector<16x64xbf16>, vector<16x64xf32> -> vector<16x64xf32>
    %226 = vector.extract_strided_slice %146 {offsets = [2, 0], sizes = [1, 64], strides = [1, 1]} : vector<4x128xf32> to vector<1x64xf32>
    %227 = vector.broadcast %226 : vector<1x64xf32> to vector<16x64xf32>
    %228 = arith.addf %225, %227 : vector<16x64xf32>
    %229 = arith.mulf %228, %228 : vector<16x64xf32>
    %230 = arith.mulf %228, %229 : vector<16x64xf32>
    %cst_64 = arith.constant 4.471500e-02 : f32
    %231 = vector.broadcast %cst_64 : f32 to vector<16x64xf32>
    %232 = arith.mulf %231, %230 : vector<16x64xf32>
    %233 = arith.addf %228, %232 : vector<16x64xf32>
    %cst_65 = arith.constant 0.797884583 : f32
    %234 = vector.broadcast %cst_65 : f32 to vector<16x64xf32>
    %235 = arith.mulf %234, %233 : vector<16x64xf32>
    %236 = math.tanh %235 : vector<16x64xf32>
    %cst_66 = arith.constant 1.000000e+00 : f32
    %237 = vector.broadcast %cst_66 : f32 to vector<16x64xf32>
    %238 = arith.addf %237, %236 : vector<16x64xf32>
    %cst_67 = arith.constant 5.000000e-01 : f32
    %239 = vector.broadcast %cst_67 : f32 to vector<16x64xf32>
    %240 = arith.mulf %239, %238 : vector<16x64xf32>
    %241 = arith.mulf %228, %240 : vector<16x64xf32>
    %242 = arith.truncf %241 : vector<16x64xf32> to vector<16x64xbf16>
    %c0_68 = arith.constant 0 : index
    %c0_69 = arith.constant 0 : index
    %243 = vector.load %arg9[%c0_68, %c0_69] : memref<64x16xbf16, #tpu.memory_space<vmem>>, vector<64x16xbf16>
    %cst_70 = arith.constant dense<0.000000e+00> : vector<16x16xf32>
    %244 = tpu.matmul %242, %243, %cst_70 {dimension_numbers = #tpu.dot_dimension_numbers<[1], [0], [0], [1], [0, 0, 1, 1], [], []>} : vector<16x64xbf16>, vector<64x16xbf16>, vector<16x16xf32> -> vector<16x16xf32>
    %245 = vector.extract_strided_slice %146 {offsets = [3, 0], sizes = [1, 16], strides = [1, 1]} : vector<4x128xf32> to vector<1x16xf32>
    %246 = vector.broadcast %245 : vector<1x16xf32> to vector<16x16xf32>
    %247 = arith.addf %244, %246 : vector<16x16xf32>
    %248 = vector.broadcast %7 : vector<1x16xf32> to vector<16x16xf32>
    %249 = arith.mulf %247, %248 : vector<16x16xf32>
    %250 = arith.addf %249, %145 : vector<16x16xf32>
    %cst_71 = arith.constant 0.000000e+00 : f32
    %251 = vector.broadcast %cst_71 : f32 to vector<8x96xf32>
    %252 = tpu.concatenate %198, %251 in 1 : vector<8x32xf32>, vector<8x96xf32> -> vector<8x128xf32>
    %cst_72 = arith.constant 0.000000e+00 : f32
    %253 = vector.broadcast %cst_72 : f32 to vector<16x112xf32>
    %254 = tpu.concatenate %250, %253 in 1 : vector<16x16xf32>, vector<16x112xf32> -> vector<16x128xf32>
    %255 = tpu.concatenate %252, %254 in 0 : vector<8x128xf32>, vector<16x128xf32> -> vector<24x128xf32>
    %c0_73 = arith.constant 0 : index
    %c0_74 = arith.constant 0 : index
    %c0_75 = arith.constant 0 : index
    %256 = vector.load %arg11[%c0_73, %c0_74, %c0_75] : memref<1x24x128xf32, #tpu.memory_space<vmem>>, vector<1x24x128xf32>
    %257 = vector.shape_cast %256 : vector<1x24x128xf32> to vector<24x128xf32>
    %258 = vector.shape_cast %255 : vector<24x128xf32> to vector<1x24x128xf32>
    tpu.vector_store %arg11[%c0_73, %c0_74, %c0_75], %258 {strides = array<i32>} : memref<1x24x128xf32, #tpu.memory_space<vmem>>, vector<1x24x128xf32>,
    return
  }
  func.func @transform_0(%arg0: i32) -> (i32, i32, i32) {
    %c0_i32 = arith.constant 0 : i32
    %c0_i32_0 = arith.constant 0 : i32
    %c0_i32_1 = arith.constant 0 : i32
    return %arg0, %c0_i32, %c0_i32_0 : i32, i32, i32
  }
  func.func @transform_1(%arg0: i32) -> (i32, i32) {
    %c0_i32 = arith.constant 0 : i32
    %c0_i32_0 = arith.constant 0 : i32
    %c0_i32_1 = arith.constant 0 : i32
    return %c0_i32, %c0_i32_0 : i32, i32
  }
  func.func @transform_2(%arg0: i32) -> (i32, i32) {
    %c0_i32 = arith.constant 0 : i32
    %c0_i32_0 = arith.constant 0 : i32
    %c0_i32_1 = arith.constant 0 : i32
    return %c0_i32, %c0_i32_0 : i32, i32
  }
  func.func @transform_3(%arg0: i32) -> (i32, i32) {
    %c0_i32 = arith.constant 0 : i32
    %c0_i32_0 = arith.constant 0 : i32
    %c0_i32_1 = arith.constant 0 : i32
    return %c0_i32, %c0_i32_0 : i32, i32
  }
  func.func @transform_4(%arg0: i32) -> (i32, i32) {
    %c0_i32 = arith.constant 0 : i32
    %c0_i32_0 = arith.constant 0 : i32
    %c0_i32_1 = arith.constant 0 : i32
    return %c0_i32, %c0_i32_0 : i32, i32
  }
  func.func @transform_5(%arg0: i32) -> (i32, i32) {
    %c0_i32 = arith.constant 0 : i32
    %c0_i32_0 = arith.constant 0 : i32
    %c0_i32_1 = arith.constant 0 : i32
    return %c0_i32, %c0_i32_0 : i32, i32
  }
  func.func @transform_6(%arg0: i32) -> (i32, i32) {
    %c0_i32 = arith.constant 0 : i32
    %c0_i32_0 = arith.constant 0 : i32
    %c0_i32_1 = arith.constant 0 : i32
    return %c0_i32, %c0_i32_0 : i32, i32
  }
  func.func @transform_7(%arg0: i32) -> (i32, i32) {
    %c0_i32 = arith.constant 0 : i32
    %c0_i32_0 = arith.constant 0 : i32
    %c0_i32_1 = arith.constant 0 : i32
    return %c0_i32, %c0_i32_0 : i32, i32
  }
  func.func @transform_8(%arg0: i32) -> (i32, i32) {
    %c0_i32 = arith.constant 0 : i32
    %c0_i32_0 = arith.constant 0 : i32
    %c0_i32_1 = arith.constant 0 : i32
    return %c0_i32, %c0_i32_0 : i32, i32
  }
  func.func @transform_9(%arg0: i32) -> (i32, i32) {
    %c0_i32 = arith.constant 0 : i32
    %c0_i32_0 = arith.constant 0 : i32
    %c0_i32_1 = arith.constant 0 : i32
    return %c0_i32, %c0_i32_0 : i32, i32
  }
  func.func @transform_10(%arg0: i32) -> (i32, i32, i32) {
    %c0_i32 = arith.constant 0 : i32
    %c0_i32_0 = arith.constant 0 : i32
    %c0_i32_1 = arith.constant 0 : i32
    return %arg0, %c0_i32, %c0_i32_0 : i32, i32, i32
  }
}

</mosaic_0001>

<bundles_post_ra>
// kernel: tpu_custom_call.1
= control target key start
LH: loop header
LB: loop body
LE: loop exit
PB: predicated region body
PF: predicated region fallthrough
CT: control target
= control target key end

     0   :  { %15 = vsyncpa [#allocation3], 0  ;;  %s2974_s0 = inlined_call_operand.vmem [shape: f32[2,36,128], index: 0, kind: input, shape index: {}]   ;;  %s2975_s1 = inlined_call_operand.vmem [shape: bf16[32,192], index: 1, kind: input, shape index: {}]   ;;  %s2976_s2 = inlined_call_operand.vmem [shape: bf16[16,192], index: 2, kind: input, shape index: {}]   ;;  %s2977_s3 = inlined_call_operand.vmem [shape: bf16[64,32], index: 3, kind: input, shape index: {}]   ;;  %s2978_s4 = inlined_call_operand.vmem [shape: bf16[64,16], index: 4, kind: input, shape index: {}]   ;;  %s2979_s5 = inlined_call_operand.vmem [shape: bf16[32,128], index: 5, kind: input, shape index: {}]   ;;  %s2980_s6 = inlined_call_operand.vmem [shape: bf16[128,32], index: 6, kind: input, shape index: {}]   ;;  %s2981_s7 = inlined_call_operand.vmem [shape: bf16[16,64], index: 7, kind: input, shape index: {}]   ;;  %s2982_s8 = inlined_call_operand.vmem [shape: bf16[64,16], index: 8, kind: input, shape index: {}]   ;;  %s2983_s9 = inlined_call_operand.vmem [shape: f32[4,128], index: 9, kind: input, shape index: {}]   ;;  %s2984_s10 = inlined_call_operand.hbm [shape: f32[2,24,128], index: 10, kind: output, shape index: {}]  }
   0x1   :  { %17 = vsyncpa [#allocation3 + $0x1], 0  ;;  %s2497_s13 = smov 0   ;;  %s2499_s14 = smov 0  }
   0x2   :  { %s2501_s15 = smov 0   ;;  %s2503_s16 = smov 0  }
   0x3 LB: > { %s2518_s17 = sadd.s32 4294967295, %s2427_s16   ;;  %s1928_s18 = sadd.s32 4294967294, %s2427_s16   ;;  %s2427_s16 = sphi %s2503_s16, %s2990_s16   ;;  %s2423_s15 = sphi %s2501_s15, %s2989_s15   ;;  %s2419_s14 = sphi %s2499_s14, %s2988_s14   ;;  %s2415_s13 = sphi %s2497_s13, %s2987_s13  }
   0x4   : > { %s2522_s19 = sadd.s32 1, %s2427_s16   ;;  %s245_s20 = sadd.s32 1, %s2423_s15 }
   0x5   : > { %s242_s21 = ssub.s32 %s2427_s16, %s2522_s19  ;;  %p255_p0 = scmp.ne.s32.totalorder %s2423_s15, %s2419_s14 }
   0x6   : > { %p243_p1 = scmp.eq.s32.totalorder %s242_s21, 0  ;;  %p256_p2 = scmp.eq.s32.totalorder %s2518_s17, 1 }
   0x7   : > { %p261_p3 = scmp.ne.s32.totalorder %s2419_s14, %s2415_s13  ;;  %p262_p4 = scmp.eq.s32.totalorder %s1928_s18, 1 }
   0x8   : > { %s2533_s22 = scalar_select %p243_p1, %s2423_s15, %s245_s20  }
   0x9   : > { %p2535_p5 = por %p256_p2, %p255_p0  ;;  %p2539_p6 = por %p262_p4, %p261_p3 }
   0xa   : > { %p1931_p7 = scmp.ge.s32.totalorder %s2427_s16, 1  ;;  %p315_p8 = scmp.lt.s32.totalorder %s2427_s16, 3 }
   0xc   : > { %p316_p9 = pnand %p1931_p7, %p315_p8 }
   0xd   : > { %p353_p10 = scmp.lt.s32.totalorder (!%p316_p9), %s2518_s17, 1  ;;  %vm364_vm0 = vcmask (!%p316_p9), 261120   ;;  %vm390_vm1 = vcmask (!%p316_p9), 130048   ;;  %v2264_v21 = vld [vmem:[%s2975_s1 + $0x4] ss:$8 sps:$4 sm:$0xff] (!%p316_p9)   ;;  %v2429_v25 = vmov (!%p316_p9), 0   ;;  %v379_v30 = vlaneseq (!%p316_p9) }
   0xe   : > { %319 = sbr.rel (%p316_p9) target bundleno = 4230 (0x1086), region = 60  ;;  %v2266_v22 = vld [vmem:[%s2975_s1] ss:$8 sps:$4 sm:$0xff] (!%p316_p9)   ;;  %458 = vmatprep.subr.bf16.mxu0 (!%p316_p9), %v2264_v21  ;;  %v2267_v23 = vld [vmem:[%s2975_s1 + $0x14] ss:$8 sps:$4 sm:$0xff] (!%p316_p9)   ;;  %490 = vmatprep.mubr.bf16.mxu0 (!%p316_p9), %v2429_v25  ;;  %s2430_s12 = smov (!%p316_p9), 64  }
   0xf   : > { %459 = vmatpush1.bf16.msra.mxu0 (!%p316_p9), %v2266_v22  ;;  %v2269_v24 = vld [vmem:[%s2975_s1 + $0x10] ss:$8 sps:$4 sm:$0xff] (!%p316_p9)   ;;  %v2270_v26 = vld [vmem:[%s2976_s2 + $0x4] ss:$8 sps:$4 sm:$0xff] (!%p316_p9)   ;;  %546 = vmatprep.mubr.bf16.mxu1 (!%p316_p9), %v2429_v25  ;;  %v2272_v27 = vld [vmem:[%s2976_s2] ss:$8 sps:$4 sm:$0xff] (!%p316_p9)  }
  0x10   : > { %460 = vmatprep.subr.bf16.mxu0 (!%p316_p9), %v2267_v23  ;;  %514 = vmatprep.subr.bf16.mxu1 (!%p316_p9), %v2270_v26  ;;  %v2583_v36 = vshrl.u32 (!%p316_p9), %v379_v30, 7  ;;  %vm669_vm2 = vcmask (!%p316_p9), 1043456   ;;  %vm627_vm3 = vcmask (!%p316_p9), 195584   ;;  %s2431_s18 = smov (!%p316_p9), 48   ;;  %s2432_s20 = smov (!%p316_p9), 112   ;;  %vm2438_vm4 = vmmov (!%p316_p9), 0  }
  0x11   : > { %515 = vmatpush1.bf16.msra.mxu1 (!%p316_p9), %v2272_v27  ;;  %s2433_s21 = smov (!%p316_p9), 32   ;;  %s2436_s27 = smov (!%p316_p9), 80   ;;  %vm1260_vm5 = vcmask (!%p316_p9), 392192   ;;  %vm1297_vm6 = vcmask (!%p316_p9), 523264  }
  0x12   : > { %v381_v39 = vsub.s32 (!%p316_p9), 4, %v2583_v36  ;;  %v386_v41 = vsub.s32 (!%p316_p9), 5, %v2583_v36  ;;  %v420_v43 = vsub.s32 (!%p316_p9), 6, %v2583_v36  ;;  %v426_v47 = vsub.s32 (!%p316_p9), 7, %v2583_v36  ;;  %s350_s28 = sand.u32 (!%p316_p9), 1, %s2419_s14  }
  0x13   : > { %461 = vmatpush1.bf16.msra.mxu0 (!%p316_p9), %v2269_v24  ;;  %s2195_s30 = smul.u32 (!%p316_p9), 24, %s350_s28 }
  0x15   : > { %s354_s25 = scalar_select %p353_p10, %s2518_s17, 1 }
  0x16   : > { %s352_s11 = scalar_lea.vmem [#allocation2], %s2195_s30 }
  0x17   : > { %s2196_s26 = smul.u32 40, %s354_s25  ;;  %s2434_s25 = smov 96  }
  0x19   : > { %s2550_s29 = scalar_lea.vmem %s2974_s0, %s2196_s26  ;;  %s2435_s26 = smov 16  }
  0x1a   : > { %v2553_v0 = vld [vmem:[%s2550_s29] sm:$0xff]  ;;  %v361_v2 = vld [vmem:[%s2550_s29 + $0x10] sm:$0xff]  ;;  %v360_v3 = vld [vmem:[%s2550_s29 + $0x8] sm:$0xff] }
  0x1b   : > { %v365_v1 = vsel %vm364_vm0, %v2553_v0, 0.0  ;;  %v394_v4 = vsel %vm390_vm1, %v361_v2, 0.0  ;;  %v391_v5 = vsel %vm390_vm1, %v360_v3, 0.0  ;;  %v2587_v40 = vld [vmem:[%s2550_s29 + $0x18] sm:$0xff] }
  0x1c   : > { %366 = vadd.xlane.f32.xlu0 %v365_v1  ;;  %395 = vadd.xlane.f32.xlu1 %v394_v4  ;;  %v382_v42 = vrot.slane %v2587_v40, %v381_v39  ;;  %v387_v46 = vrot.slane %v2587_v40, %v386_v41  ;;  %v421_v49 = vrot.slane %v2587_v40, %v420_v43 }
  0x1d   : > { %v427_v54 = vrot.slane %v2587_v40, %v426_v47 }
  0x20   : > { %392 = vadd.xlane.f32.xlu0 %v391_v5 }
  0xa9   : > { %v367_v6 = vpop.xlane.xlu0 %366  ;;  %v396_v8 = vpop.xlane.xlu1 %395 }
  0xaa   : > { %v369_v7 = vmul.f32 0.03125, %v367_v6  ;;  %v399_v9 = vmul.f32 0.0625, %v396_v8 }
  0xac   : > { %v370_v10 = vsub.f32 %v2553_v0, %v369_v7  ;;  %v401_v11 = vsub.f32 %v361_v2, %v399_v9 }
  0xad   : > { %v393_v12 = vpop.xlane.xlu0 %392 }
  0xae   : > { %v398_v13 = vmul.f32 0.0625, %v393_v12  ;;  %v371_v14 = vmul.f32 %v370_v10, %v370_v10  ;;  %v403_v15 = vmul.f32 %v401_v11, %v401_v11 }
  0xb0   : > { %v400_v16 = vsub.f32 %v360_v3, %v398_v13  ;;  %v372_v17 = vsel %vm364_vm0, %v371_v14, 0.0  ;;  %v407_v18 = vsel %vm390_vm1, %v403_v15, 0.0 }
  0xb1   : > { %373 = vadd.xlane.f32.xlu1 %v372_v17 }
  0xb2   : > { %v402_v19 = vmul.f32 %v400_v16, %v400_v16 }
  0xb4   : > { %v404_v20 = vsel %vm390_vm1, %v402_v19, 0.0 }
  0xb5   : > { %408 = vadd.xlane.f32.xlu1 %v407_v18  ;;  %405 = vadd.xlane.f32.xlu0 %v404_v20 }
 0x13e   : > { %v374_v28 = vpop.xlane.xlu1 %373 }
 0x13f   : > { %v375_v29 = vmul.f32 0.03125, %v374_v28 }
 0x141   : > { %v376_v31 = vadd.f32 1e-05, %v375_v29 }
 0x142   : > { %v409_v32 = vpop.xlane.xlu1 %408  ;;  %v406_v33 = vpop.xlane.xlu0 %405 }
 0x143   : > { %2296 = vrsqrt.f32 %v376_v31  ;;  %v411_v34 = vmul.f32 0.0625, %v409_v32  ;;  %v410_v35 = vmul.f32 0.0625, %v406_v33 }
 0x145   : > { %v413_v37 = vadd.f32 1e-05, %v411_v34  ;;  %v412_v38 = vadd.f32 1e-05, %v410_v35 }
 0x147   : > { %2298 = vrsqrt.f32 %v413_v37 }
 0x148   : > { %2300 = vrsqrt.f32 %v412_v38 }
 0x14d   : > { %v2297_v44 = vpop.eup %2296 }
 0x14e   : > { %v378_v45 = vmul.f32 %v2297_v44, %v370_v10 }
 0x150   : > { %v383_v48 = vmul.f32 %v382_v42, %v378_v45 }
 0x151   : > { %v2299_v50 = vpop.eup %2298 }
 0x152   : > { %v2301_v51 = vpop.eup %2300  ;;  %v417_v52 = vmul.f32 %v2299_v50, %v401_v11  ;;  %v388_v53 = vadd.f32 %v387_v46, %v383_v48 }
 0x153   : > { %v416_v55 = vmul.f32 %v2301_v51, %v400_v16 }
 0x154   : > { %v389_v56 = vpack.c.bf16 %v388_v53, %v388_v53  ;;  %v423_v57 = vmul.f32 %v421_v49, %v417_v52 }
 0x155   : > { %v422_v58 = vmul.f32 %v421_v49, %v416_v55 }
 0x156   : > { %1937 = vmatmul.mubr.msk.bf16.vlgmr.msra.gmra.mrb[0].mxu0 %vm364_vm0, %v389_v56  ;;  %v429_v59 = vadd.f32 %v427_v54, %v423_v57 }
 0x157   : > { %v428_v60 = vadd.f32 %v427_v54, %v422_v58 }
 0x159   : > { %v430_v61 = vpack.c.bf16 %v429_v59, %v428_v60 }
 0x15b   : > { %1940 = vmatmul.mubr.msk.bf16.vlgmr.msra.gmra.mrb[0].mxu1 %vm390_vm1, %v430_v61 }
 0x229   : > { %v492_v62 = vpop.f32.mrb[0].mxu0 }
 0x22a   : > { %v494_v63 = vpop.f32.mrb[1].mxu0 }
 0x22b   : > { %v496_v1 = vpop.f32.mrb[2].mxu0 }
 0x22c   : > { %v497_v2 = vpop.f32.mrb[3].mxu0 }
 0x22e   : > { %v548_v3 = vpop.f32.mrb[0].mxu1 }
 0x22f   : > { %v2598_v4 = vpack.c.bf16 %v548_v3, %v492_v62  ;;  %v550_v5 = vpop.f32.mrb[1].mxu1 }
 0x230   : > { %v2600_v6 = vpack.c.bf16 %v550_v5, %v494_v63  ;;  %v552_v7 = vpop.f32.mrb[2].mxu1 }
 0x231   : > { %v2602_v8 = vpack.c.bf16 %v552_v7, %v552_v7  ;;  %563 = vrot.lane.b32.xlu0 %v2598_v4, %s2430_s12  ;;  %v554_v9 = vpop.f32.mrb[3].mxu1  ;;  %2053 = vmatprep.mubr.msk.bf16.mxu1 %vm390_vm1, %v2598_v4 }
 0x232   : > { %v2607_v10 = vpack.c.bf16 %v554_v9, %v554_v9  ;;  %2057 = vmatprep.subr.bf16.mxu0 %v2600_v6 }
 0x233   : > { %2058 = vmatpush3.bf16.msra.mxu0 %v2600_v6  ;;  %565 = vrot.lane.b32.xlu1 %v2602_v8, %s2430_s12  ;;  %s2197_s12 = smul.u32 384, %s2518_s17  ;;  %s2933_s17 = scalar_lea.sflag [#allocation3], %s350_s28 }
 0x234   : > { %2185 = vmatprep.subr.msk.bf16.mxu0 %vm669_vm2, %v2607_v10  ;;  %v671_v11 = vsel %vm669_vm2, %v2607_v10, 0 }
 0x237   : > { %2060 = vmatpush3.bf16.msra.mxu0 %v671_v11 }
 0x2a3   : > { %v564_v12 = vpop.permute.xlu0 %563 }
 0x2a4   : > { %v574_v13 = vsel %vm390_vm1, %v564_v12, 0  ;;  %2183 = vmatprep.subr.msk.bf16.mxu1 %vm390_vm1, %v564_v12 }
 0x2a5   : > { %2050 = vmatpush3.bf16.xpose.msra.mxu1 %v574_v13  ;;  %v566_v14 = vpop.permute.xlu1 %565 }
 0x2a6   : > { %2184 = vmatprep.subr.msk.bf16.mxu1 %vm390_vm1, %v566_v14  ;;  %v577_v15 = vsel %vm390_vm1, %v566_v14, 0 }
 0x2ad   : > { %2052 = vmatpush3.bf16.xpose.msra.mxu1 %v577_v15 }
 0x2b4   : > { %2054 = vmatmul.mubr.msk.bf16.vlgmr.msra.gmra.mrb[4].mxu1 %vm390_vm1, %v2602_v8 }
 0x387   : > { %v2055_v16 = vpop.f32.mrb[4].mxu1 }
 0x388   : > { %v613_v17 = vpop.f32.mrb[5].mxu1  ;;  %v634_v22 = vsel %vm627_vm3, %v2055_v16, -inf }
 0x389   : > { %v2056_v18 = vpop.f32.mrb[6].mxu1  ;;  %v628_v19 = vsel %vm627_vm3, %v613_v17, -inf }
 0x38a   : > { %629 = vmax.xlane.f32.xlu1 %v628_v19  ;;  %v616_v20 = vpop.f32.mrb[7].mxu1 }
 0x38b   : > { %v631_v21 = vsel %vm627_vm3, %v616_v20, -inf }
 0x38c   : > { %632 = vmax.xlane.f32.xlu0 %v631_v21 }
 0x390   : > { %635 = vmax.xlane.f32.xlu0 %v634_v22 }
 0x417   : > { %v630_v23 = vpop.xlane.xlu1 %629 }
 0x418   : > { %v637_v24 = vsub.f32 %v613_v17, %v630_v23 }
 0x419   : > { %v633_v25 = vpop.xlane.xlu0 %632 }
 0x41a   : > { %v640_v26 = vmul.f32 1.442695, %v637_v24  ;;  %v638_v27 = vsub.f32 %v616_v20, %v633_v25 }
 0x41c   : > { %2302 = vpow2.f32 %v640_v26  ;;  %v642_v28 = vmul.f32 1.442695, %v638_v27 }
 0x41d   : > { %v636_v29 = vpop.xlane.xlu0 %635 }
 0x41e   : > { %2304 = vpow2.f32 %v642_v28  ;;  %v639_v30 = vsub.f32 %v2055_v16, %v636_v29 }
 0x420   : > { %v644_v31 = vmul.f32 1.442695, %v639_v30 }
 0x422   : > { %2306 = vpow2.f32 %v644_v31 }
 0x426   : > { %v2303_v32 = vpop.eup %2302 }
 0x427   : > { %v646_v33 = vsel %vm627_vm3, %v2303_v32, 0.0 }
 0x428   : > { %v2305_v34 = vpop.eup %2304  ;;  %647 = vadd.xlane.f32.xlu1 %v646_v33 }
 0x429   : > { %v649_v35 = vsel %vm627_vm3, %v2305_v34, 0.0 }
 0x42a   : > { %650 = vadd.xlane.f32.xlu0 %v649_v35 }
 0x42c   : > { %v2307_v37 = vpop.eup %2306 }
 0x42d   : > { %v652_v38 = vsel %vm627_vm3, %v2307_v37, 0.0 }
 0x42e   : > { %653 = vadd.xlane.f32.xlu1 %v652_v38 }
 0x43f   : > { %727 = vrot.lane.b32.xlu1 %v2602_v8, %s2431_s18 }
 0x440   : > { %725 = vrot.lane.b32.xlu0 %v2598_v4, %s2431_s18 }
 0x443   : > { %721 = vrot.lane.b32.xlu1 %v2598_v4, %s2432_s20 }
 0x447   : > { %723 = vrot.lane.b32.xlu1 %v2602_v8, %s2432_s20 }
 0x4b5   : > { %v648_v39 = vpop.xlane.xlu1 %647 }
 0x4b6   : > { %2308 = vrcp.f32 %v648_v39 }
 0x4b7   : > { %v651_v41 = vpop.xlane.xlu0 %650 }
 0x4b8   : > { %2310 = vrcp.f32 %v651_v41 }
 0x4bb   : > { %v654_v42 = vpop.xlane.xlu1 %653  ;;  %v726_v43 = vpop.permute.xlu0 %725 }
 0x4bc   : > { %2312 = vrcp.f32 %v654_v42  ;;  %2186 = vmatprep.subr.msk.bf16.mxu0 %vm390_vm1, %v726_v43  ;;  %v736_v53 = vsel %vm390_vm1, %v726_v43, 0 }
 0x4bf   : > { %v728_v48 = vpop.permute.xlu1 %727 }
 0x4c0   : > { %v2309_v44 = vpop.eup %2308  ;;  %v739_v55 = vsel %vm390_vm1, %v728_v48, 0 }
 0x4c1   : > { %v658_v46 = vmul.f32 %v2309_v44, %v2303_v32 }
 0x4c2   : > { %v2311_v45 = vpop.eup %2310 }
 0x4c3   : > { %v659_v47 = vmul.f32 %v2311_v45, %v2305_v34  ;;  %v722_v54 = vpop.permute.xlu1 %721 }
 0x4c5   : > { %v661_v49 = vpack.c.bf16 %v659_v47, %v658_v46 }
 0x4c6   : > { %v2313_v50 = vpop.eup %2312 }
 0x4c7   : > { %v660_v51 = vmul.f32 %v2313_v50, %v2307_v37  ;;  %2061 = vmatprep.mubr.msk.bf16.mxu0 %vm627_vm3, %v661_v49  ;;  %v724_v56 = vpop.permute.xlu1 %723 }
 0x4c9   : > { %v662_v52 = vpack.c.bf16 %v660_v51, %v660_v51 }
 0x4cb   : > { %2062 = vmatmul.mubr.msk.bf16.vlgmr.msra.gmra.mrb[4].mxu0 %vm627_vm3, %v662_v52 }
 0x4cc   : > { %2066 = vmatpush3.bf16.xpose.msra.mxu0 %v736_v53  ;;  %2069 = vmatprep.mubr.msk.bf16.mxu0 %vm390_vm1, %v722_v54 }
 0x4cd   : > { %2187 = vmatprep.subr.msk.bf16.mxu0 %vm390_vm1, %v728_v48 }
 0x4d4   : > { %2068 = vmatpush3.bf16.xpose.msra.mxu0 %v739_v55 }
 0x4db   : > { %2070 = vmatmul.mubr.msk.bf16.vlgmr.msra.gmra.mrb[8].mxu0 %vm390_vm1, %v724_v56 }
 0x59e   : > { %v2644_v57 = vpop.f32.mrb[4].mxu0 }
 0x59f   : > { %v2646_v58 = vpop.f32.mrb[5].mxu0 }
 0x5a0   : > { %v2064_v59 = vpop.f32.mrb[6].mxu0 }
 0x5a1   : > { %v2648_v60 = vpop.f32.mrb[7].mxu0 }
 0x5ae   : > { %v2071_v61 = vpop.f32.mrb[8].mxu0 }
 0x5af   : > { %v775_v62 = vpop.f32.mrb[9].mxu0  ;;  %v795_v5 = vsel %vm627_vm3, %v2071_v61, -inf }
 0x5b0   : > { %v2072_v63 = vpop.f32.mrb[10].mxu0  ;;  %v789_v1 = vsel %vm627_vm3, %v775_v62, -inf }
 0x5b1   : > { %790 = vmax.xlane.f32.xlu0 %v789_v1  ;;  %v778_v2 = vpop.f32.mrb[11].mxu0 }
 0x5b2   : > { %v792_v3 = vsel %vm627_vm3, %v778_v2, -inf }
 0x5b3   : > { %793 = vmax.xlane.f32.xlu1 %v792_v3 }
 0x5b5   : > { %796 = vmax.xlane.f32.xlu0 %v795_v5 }
 0x63e   : > { %v791_v7 = vpop.xlane.xlu0 %790 }
 0x63f   : > { %v798_v9 = vsub.f32 %v775_v62, %v791_v7 }
 0x640   : > { %v794_v11 = vpop.xlane.xlu1 %793 }
 0x641   : > { %v801_v12 = vmul.f32 1.442695, %v798_v9  ;;  %v799_v13 = vsub.f32 %v778_v2, %v794_v11 }
 0x642   : > { %v797_v14 = vpop.xlane.xlu0 %796 }
 0x643   : > { %2314 = vpow2.f32 %v801_v12  ;;  %v803_v15 = vmul.f32 1.442695, %v799_v13  ;;  %v800_v16 = vsub.f32 %v2071_v61, %v797_v14 }
 0x645   : > { %2316 = vpow2.f32 %v803_v15  ;;  %v805_v17 = vmul.f32 1.442695, %v800_v16 }
 0x647   : > { %2318 = vpow2.f32 %v805_v17 }
 0x64d   : > { %v2315_v18 = vpop.eup %2314 }
 0x64e   : > { %v807_v19 = vsel %vm627_vm3, %v2315_v18, 0.0 }
 0x64f   : > { %v2317_v20 = vpop.eup %2316  ;;  %808 = vadd.xlane.f32.xlu0 %v807_v19 }
 0x650   : > { %v810_v23 = vsel %vm627_vm3, %v2317_v20, 0.0 }
 0x651   : > { %v2319_v21 = vpop.eup %2318 }
 0x652   : > { %v813_v22 = vsel %vm627_vm3, %v2319_v21, 0.0 }
 0x653   : > { %814 = vadd.xlane.f32.xlu1 %v813_v22  ;;  %811 = vadd.xlane.f32.xlu0 %v810_v23 }
 0x664   : > { %828 = vrot.lane.b32.xlu1 %v2607_v10, %s2432_s20 }
 0x668   : > { %892 = vrot.lane.b32.xlu1 %v2598_v4, %s2433_s21 }
 0x669   : > { %826 = vrot.lane.b32.xlu0 %v2600_v6, %s2432_s20 }
 0x66c   : > { %894 = vrot.lane.b32.xlu1 %v2602_v8, %s2433_s21 }
 0x66d   : > { %888 = vrot.lane.b32.xlu0 %v2598_v4, %s2434_s25 }
 0x670   : > { %890 = vrot.lane.b32.xlu1 %v2602_v8, %s2434_s25 }
 0x6dc   : > { %v809_v24 = vpop.xlane.xlu0 %808 }
 0x6dd   : > { %2320 = vrcp.f32 %v809_v24 }
 0x6e0   : > { %v812_v25 = vpop.xlane.xlu0 %811  ;;  %v815_v26 = vpop.xlane.xlu1 %814 }
 0x6e1   : > { %2322 = vrcp.f32 %v812_v25 }
 0x6e2   : > { %2324 = vrcp.f32 %v815_v26 }
 0x6e4   : > { %v827_v27 = vpop.permute.xlu0 %826  ;;  %v829_v28 = vpop.permute.xlu1 %828 }
 0x6e5   : > { %2073 = vmatprep.subr.bf16.mxu1 %v827_v27  ;;  %v838_v30 = vsel %vm669_vm2, %v829_v28, 0 }
 0x6e6   : > { %2074 = vmatpush3.bf16.msra.mxu1 %v827_v27 }
 0x6e7   : > { %2188 = vmatprep.subr.msk.bf16.mxu1 %vm669_vm2, %v829_v28  ;;  %v2321_v29 = vpop.eup %2320 }
 0x6e8   : > { %v893_v31 = vpop.permute.xlu1 %892  ;;  %v819_v34 = vmul.f32 %v2321_v29, %v2315_v18  ;;  %v889_v41 = vpop.permute.xlu0 %888 }
 0x6e9   : > { %v903_v42 = vsel %vm390_vm1, %v893_v31, 0 }
 0x6ea   : > { %2076 = vmatpush3.bf16.msra.mxu1 %v838_v30 }
 0x6eb   : > { %v2323_v32 = vpop.eup %2322  ;;  %2189 = vmatprep.subr.msk.bf16.mxu1 %vm390_vm1, %v893_v31 }
 0x6ec   : > { %v2325_v33 = vpop.eup %2324  ;;  %v820_v35 = vmul.f32 %v2323_v32, %v2317_v20  ;;  %v895_v43 = vpop.permute.xlu1 %894 }
 0x6ed   : > { %v821_v37 = vmul.f32 %v2325_v33, %v2319_v21  ;;  %v906_v44 = vsel %vm390_vm1, %v895_v43, 0 }
 0x6ee   : > { %v822_v38 = vpack.c.bf16 %v820_v35, %v819_v34 }
 0x6ef   : > { %v823_v39 = vpack.c.bf16 %v821_v37, %v821_v37 }
 0x6f0   : > { %2077 = vmatprep.mubr.msk.bf16.mxu1 %vm627_vm3, %v822_v38  ;;  %v891_v45 = vpop.permute.xlu1 %890 }
 0x6f1   : > { %2078 = vmatmul.mubr.msk.bf16.vlgmr.msra.gmra.mrb[8].mxu1 %vm627_vm3, %v823_v39 }
 0x6f2   : > { %2085 = vmatprep.mubr.msk.bf16.mxu1 %vm390_vm1, %v889_v41 }
 0x6f3   : > { %2082 = vmatpush3.bf16.xpose.msra.mxu1 %v903_v42 }
 0x6f4   : > { %2190 = vmatprep.subr.msk.bf16.mxu1 %vm390_vm1, %v895_v43 }
 0x6fb   : > { %2084 = vmatpush3.bf16.xpose.msra.mxu1 %v906_v44 }
 0x702   : > { %2086 = vmatmul.mubr.msk.bf16.vlgmr.msra.gmra.mrb[12].mxu1 %vm390_vm1, %v891_v45 }
 0x7c4   : > { %v2678_v46 = vpop.f32.mrb[8].mxu1 }
 0x7c5   : > { %v2680_v47 = vpop.f32.mrb[9].mxu1 }
 0x7c6   : > { %v2080_v48 = vpop.f32.mrb[10].mxu1 }
 0x7c7   : > { %v2682_v49 = vpop.f32.mrb[11].mxu1 }
 0x7c8   : > { %v2249_v50 = vpack.i.bf16 %v2682_v49, %v2680_v47 }
 0x7d5   : > { %v2087_v51 = vpop.f32.mrb[12].mxu1 }
 0x7d6   : > { %v942_v52 = vpop.f32.mrb[13].mxu1  ;;  %v962_v59 = vsel %vm627_vm3, %v2087_v51, -inf }
 0x7d7   : > { %v2088_v53 = vpop.f32.mrb[14].mxu1  ;;  %v956_v54 = vsel %vm627_vm3, %v942_v52, -inf }
 0x7d8   : > { %957 = vmax.xlane.f32.xlu0 %v956_v54  ;;  %v945_v55 = vpop.f32.mrb[15].mxu1 }
 0x7d9   : > { %v959_v56 = vsel %vm627_vm3, %v945_v55, -inf }
 0x7da   : > { %960 = vmax.xlane.f32.xlu1 %v959_v56 }
 0x7dc   : > { %963 = vmax.xlane.f32.xlu0 %v962_v59 }
 0x865   : > { %v958_v61 = vpop.xlane.xlu0 %957 }
 0x866   : > { %v965_v62 = vsub.f32 %v942_v52, %v958_v61 }
 0x867   : > { %v961_v63 = vpop.xlane.xlu1 %960 }
 0x868   : > { %v968_v1 = vmul.f32 1.442695, %v965_v62  ;;  %v966_v2 = vsub.f32 %v945_v55, %v961_v63 }
 0x869   : > { %v964_v3 = vpop.xlane.xlu0 %963 }
 0x86a   : > { %2326 = vpow2.f32 %v968_v1  ;;  %v970_v5 = vmul.f32 1.442695, %v966_v2  ;;  %v967_v7 = vsub.f32 %v2087_v51, %v964_v3 }
 0x86c   : > { %2328 = vpow2.f32 %v970_v5  ;;  %v972_v9 = vmul.f32 1.442695, %v967_v7 }
 0x86e   : > { %2330 = vpow2.f32 %v972_v9 }
 0x874   : > { %v2327_v11 = vpop.eup %2326 }
 0x875   : > { %v974_v12 = vsel %vm627_vm3, %v2327_v11, 0.0 }
 0x876   : > { %v2329_v13 = vpop.eup %2328  ;;  %975 = vadd.xlane.f32.xlu0 %v974_v12 }
 0x877   : > { %v977_v16 = vsel %vm627_vm3, %v2329_v13, 0.0 }
 0x878   : > { %v2331_v14 = vpop.eup %2330 }
 0x879   : > { %v980_v15 = vsel %vm627_vm3, %v2331_v14, 0.0 }
 0x87a   : > { %981 = vadd.xlane.f32.xlu1 %v980_v15  ;;  %978 = vadd.xlane.f32.xlu0 %v977_v16 }
 0x88b   : > { %993 = vrot.lane.b32.xlu1 %v2607_v10, %s2434_s25 }
 0x88f   : > { %1057 = vrot.lane.b32.xlu1 %v2598_v4, %s2435_s26 }
 0x890   : > { %991 = vrot.lane.b32.xlu0 %v2600_v6, %s2434_s25 }
 0x893   : > { %1059 = vrot.lane.b32.xlu1 %v2602_v8, %s2435_s26 }
 0x894   : > { %1053 = vrot.lane.b32.xlu0 %v2598_v4, %s2436_s27 }
 0x897   : > { %1055 = vrot.lane.b32.xlu1 %v2602_v8, %s2436_s27 }
 0x903   : > { %v976_v17 = vpop.xlane.xlu0 %975 }
 0x904   : > { %2332 = vrcp.f32 %v976_v17 }
 0x907   : > { %v979_v18 = vpop.xlane.xlu0 %978  ;;  %v982_v19 = vpop.xlane.xlu1 %981 }
 0x908   : > { %2334 = vrcp.f32 %v979_v18 }
 0x909   : > { %2336 = vrcp.f32 %v982_v19 }
 0x90b   : > { %v992_v20 = vpop.permute.xlu0 %991  ;;  %v994_v21 = vpop.permute.xlu1 %993 }
 0x90c   : > { %2089 = vmatprep.subr.bf16.mxu0 %v992_v20  ;;  %v1003_v23 = vsel %vm669_vm2, %v994_v21, 0 }
 0x90d   : > { %2090 = vmatpush3.bf16.msra.mxu0 %v992_v20  ;;  %v2273_v20 = vld [vmem:[%s2977_s3] sm:$0xff]  }
 0x90e   : > { %2191 = vmatprep.subr.msk.bf16.mxu0 %vm669_vm2, %v994_v21  ;;  %v2333_v22 = vpop.eup %2332  ;;  %v2275_v21 = vld [vmem:[%s2978_s4] sm:$0xff]  }
 0x90f   : > { %v1058_v24 = vpop.permute.xlu1 %1057  ;;  %v986_v25 = vmul.f32 %v2333_v22, %v2327_v11  ;;  %v1054_v30 = vpop.permute.xlu0 %1053  ;;  %v2437_v22 = vmov 0.0  }
 0x910   : > { %v1068_v31 = vsel %vm390_vm1, %v1058_v24, 0 }
 0x911   : > { %2092 = vmatpush3.bf16.msra.mxu0 %v1003_v23  ;;  %v2274_v23 = vld [vmem:[%s2977_s3 + $0x8] sm:$0xff]  }
 0x912   : > { %v2335_v4 = vpop.eup %2334  ;;  %2192 = vmatprep.subr.msk.bf16.mxu0 %vm390_vm1, %v1058_v24  ;;  %v2277_v24 = vld [vmem:[%s2978_s4 + $0x8] sm:$0xff]  }
 0x913   : > { %v2337_v8 = vpop.eup %2336  ;;  %v987_v26 = vmul.f32 %v2335_v4, %v2329_v13  ;;  %v1060_v32 = vpop.permute.xlu1 %1059  ;;  %v2276_v4 = vld [vmem:[%s2977_s3 + $0x10] sm:$0xff]  }
 0x914   : > { %v988_v27 = vmul.f32 %v2337_v8, %v2331_v14  ;;  %v1071_v33 = vsel %vm390_vm1, %v1060_v32, 0  ;;  %v2278_v8 = vld [vmem:[%s2977_s3 + $0x18] sm:$0xff]  }
 0x915   : > { %v989_v28 = vpack.c.bf16 %v987_v26, %v986_v25  ;;  %v2279_v25 = vld [vmem:[%s2978_s4 + $0x10] sm:$0xff]   ;;  %v2280_v26 = vld [vmem:[%s2978_s4 + $0x18] sm:$0xff]  }
 0x916   : > { %v990_v29 = vpack.c.bf16 %v988_v27, %v988_v27 }
 0x917   : > { %2093 = vmatprep.mubr.msk.bf16.mxu0 %vm627_vm3, %v989_v28  ;;  %v1056_v34 = vpop.permute.xlu1 %1055 }
 0x918   : > { %2094 = vmatmul.mubr.msk.bf16.vlgmr.msra.gmra.mrb[12].mxu0 %vm627_vm3, %v990_v29 }
 0x919   : > { %2101 = vmatprep.mubr.msk.bf16.mxu0 %vm390_vm1, %v1054_v30 }
 0x91a   : > { %2098 = vmatpush3.bf16.xpose.msra.mxu0 %v1068_v31 }
 0x91b   : > { %2193 = vmatprep.subr.msk.bf16.mxu0 %vm390_vm1, %v1060_v32 }
 0x922   : > { %2100 = vmatpush3.bf16.xpose.msra.mxu0 %v1071_v33 }
 0x923   : > { %2125 = vmatprep.subr.bf16.mxu0 %v2437_v22 }
 0x929   : > { %2102 = vmatmul.mubr.msk.bf16.vlgmr.msra.gmra.mrb[16].mxu0 %vm390_vm1, %v1056_v34 }
 0x92a   : > { %2126 = vmatpush3.bf16.msra.mxu0 %v2275_v21  ;;  %2133 = vmatprep.mubr.msk.bf16.mxu0 %vm2438_vm4, %v2437_v22 }
 0x92b   : > { %2127 = vmatprep.subr.bf16.mxu0 %v2437_v22 }
 0x92e   : > { %2128 = vmatpush3.bf16.msra.mxu0 %v2277_v24 }
 0x92f   : > { %2129 = vmatprep.subr.bf16.mxu0 %v2437_v22 }
 0x932   : > { %2130 = vmatpush3.bf16.msra.mxu0 %v2279_v25 }
 0x933   : > { %2131 = vmatprep.subr.bf16.mxu0 %v2437_v22 }
 0x936   : > { %2132 = vmatpush3.bf16.msra.mxu0 %v2280_v26 }
 0x937   : > { %2145 = vmatprep.subr.bf16.mxu0 %v2437_v22 }
 0x9eb   : > { %v2714_v35 = vpop.f32.mrb[12].mxu0 }
 0x9ec   : > { %v1039_v37 = vpop.f32.mrb[13].mxu0 }
 0x9ed   : > { %v2096_v38 = vpop.f32.mrb[14].mxu0 }
 0x9ee   : > { %v1042_v39 = vpop.f32.mrb[15].mxu0 }
 0x9ef   : > { %v2254_v41 = vpack.i.bf16 %v1042_v39, %v1039_v37 }
 0x9fc   : > { %v2103_v42 = vpop.f32.mrb[16].mxu0 }
 0x9fd   : > { %v1107_v43 = vpop.f32.mrb[17].mxu0  ;;  %v1127_v52 = vsel %vm627_vm3, %v2103_v42, -inf }
 0x9fe   : > { %v2104_v44 = vpop.f32.mrb[18].mxu0  ;;  %v1121_v45 = vsel %vm627_vm3, %v1107_v43, -inf }
 0x9ff   : > { %1122 = vmax.xlane.f32.xlu0 %v1121_v45  ;;  %v1110_v48 = vpop.f32.mrb[19].mxu0 }
 0xa00   : > { %v1124_v51 = vsel %vm627_vm3, %v1110_v48, -inf }
 0xa01   : > { %1125 = vmax.xlane.f32.xlu1 %v1124_v51 }
 0xa03   : > { %1128 = vmax.xlane.f32.xlu0 %v1127_v52 }
 0xa8c   : > { %v1123_v53 = vpop.xlane.xlu0 %1122 }
 0xa8d   : > { %v1130_v54 = vsub.f32 %v1107_v43, %v1123_v53 }
 0xa8e   : > { %v1126_v55 = vpop.xlane.xlu1 %1125 }
 0xa8f   : > { %v1133_v56 = vmul.f32 1.442695, %v1130_v54  ;;  %v1131_v59 = vsub.f32 %v1110_v48, %v1126_v55 }
 0xa90   : > { %v1129_v61 = vpop.xlane.xlu0 %1128 }
 0xa91   : > { %2338 = vpow2.f32 %v1133_v56  ;;  %v1135_v62 = vmul.f32 1.442695, %v1131_v59  ;;  %v1132_v63 = vsub.f32 %v2103_v42, %v1129_v61 }
 0xa93   : > { %2340 = vpow2.f32 %v1135_v62  ;;  %v1137_v1 = vmul.f32 1.442695, %v1132_v63  ;;  %v2803_v63 = vsub.s32 1, %v2583_v36 }
 0xa95   : > { %2342 = vpow2.f32 %v1137_v1 }
 0xa9b   : > { %v2339_v2 = vpop.eup %2338 }
 0xa9c   : > { %v1139_v3 = vsel %vm627_vm3, %v2339_v2, 0.0 }
 0xa9d   : > { %v2341_v5 = vpop.eup %2340  ;;  %1140 = vadd.xlane.f32.xlu0 %v1139_v3 }
 0xa9e   : > { %v1142_v11 = vsel %vm627_vm3, %v2341_v5, 0.0 }
 0xa9f   : > { %v2343_v7 = vpop.eup %2342 }
 0xaa0   : > { %v1145_v9 = vsel %vm627_vm3, %v2343_v7, 0.0 }
 0xaa1   : > { %1146 = vadd.xlane.f32.xlu1 %v1145_v9  ;;  %1143 = vadd.xlane.f32.xlu0 %v1142_v11  ;;  %v1427_v11 = vrot.slane %v2587_v40, %v2803_v63 }
 0xab2   : > { %1158 = vrot.lane.b32.xlu1 %v2607_v10, %s2436_s27 }
 0xab6   : > { %2250 = vrot.lane.b32.xlu1 %v2249_v50, %s2435_s26 }
 0xab7   : > { %1156 = vrot.lane.b32.xlu0 %v2600_v6, %s2436_s27 }
 0xaba   : > { %2255 = vrot.lane.b32.xlu1 %v2254_v41, %s2433_s21 }
 0xabe   : > { %1225 = vrot.lane.b32.xlu1 %v2678_v46, %s2435_s26  ;;  %s2928_s26 = scalar_lea.hbm %s2984_s10, %s2197_s12 }
 0xb2a   : > { %v1141_v12 = vpop.xlane.xlu0 %1140 }
 0xb2b   : > { %2344 = vrcp.f32 %v1141_v12 }
 0xb2e   : > { %v1144_v13 = vpop.xlane.xlu0 %1143  ;;  %v1147_v14 = vpop.xlane.xlu1 %1146 }
 0xb2f   : > { %2346 = vrcp.f32 %v1144_v13 }
 0xb30   : > { %2348 = vrcp.f32 %v1147_v14 }
 0xb32   : > { %v1157_v10 = vpop.permute.xlu0 %1156  ;;  %v1159_v15 = vpop.permute.xlu1 %1158 }
 0xb33   : > { %2105 = vmatprep.subr.bf16.mxu1 %v1157_v10  ;;  %v1168_v6 = vsel %vm669_vm2, %v1159_v15, 0 }
 0xb34   : > { %2106 = vmatpush3.bf16.msra.mxu1 %v1157_v10 }
 0xb35   : > { %2194 = vmatprep.subr.msk.bf16.mxu1 %vm669_vm2, %v1159_v15  ;;  %v2345_v47 = vpop.eup %2344 }
 0xb36   : > { %v1151_v16 = vmul.f32 %v2345_v47, %v2339_v2  ;;  %v2251_v32 = vpop.permute.xlu1 %2250  ;;  %v2362_v47 = vld [vmem:[%s2550_s29 + $0x8] sm:$0xff] }
 0xb37   : > { %v2252_v34 = vunpack.i.l.bf16 %v2251_v32  ;;  %v2253_v43 = vunpack.i.h.bf16 %v2251_v32  ;;  %v2282_v32 = vld [vmem:[%s2979_s5 + $0x8] sm:$0xff]  }
 0xb38   : > { %2108 = vmatpush3.bf16.msra.mxu1 %v1168_v6 }
 0xb39   : > { %v2347_v49 = vpop.eup %2346  ;;  %2113 = vmatprep.subr.bf16.mxu1 %v2437_v22  ;;  %v1254_v38 = vsel %vm390_vm1, %v2646_v58, %v2252_v34  ;;  %v1255_v58 = vsel %vm390_vm1, %v2648_v60, %v2253_v43  ;;  %v2798_v60 = vsub.s32 0, %v2583_v36 }
 0xb3a   : > { %v2349_v50 = vpop.eup %2348  ;;  %v1152_v46 = vmul.f32 %v2347_v49, %v2341_v5  ;;  %v2256_v33 = vpop.permute.xlu1 %2255 }
 0xb3b   : > { %v1153_v17 = vmul.f32 %v2349_v50, %v2343_v7  ;;  %v2257_v37 = vunpack.i.l.bf16 %v2256_v33  ;;  %v2258_v45 = vunpack.i.h.bf16 %v2256_v33  ;;  %v1421_v62 = vrot.slane %v2587_v40, %v2798_v60 }
 0xb3c   : > { %v1154_v18 = vpack.c.bf16 %v1152_v46, %v1151_v16  ;;  %v2363_v16 = vld [vmem:[%s2550_s29 + $0x10] sm:$0xff] }
 0xb3d   : > { %v1155_v19 = vpack.c.bf16 %v1153_v17, %v1153_v17  ;;  %v1257_v42 = vsel %vm364_vm0, %v1254_v38, %v2257_v37  ;;  %v1258_v56 = vsel %vm364_vm0, %v1255_v58, %v2258_v45  ;;  %v2840_v58 = vsub.s32 2, %v2583_v36 }
 0xb3e   : > { %2109 = vmatprep.mubr.msk.bf16.mxu1 %vm627_vm3, %v1154_v18  ;;  %v1226_v39 = vpop.permute.xlu1 %1225 }
 0xb3f   : > { %2110 = vmatmul.mubr.msk.bf16.vlgmr.msra.gmra.mrb[16].mxu1 %vm627_vm3, %v1155_v19  ;;  %v1256_v48 = vsel %vm390_vm1, %v2644_v57, %v1226_v39 }
 0xb40   : > { %2114 = vmatpush3.bf16.msra.mxu1 %v2273_v20  ;;  %2121 = vmatprep.mubr.msk.bf16.mxu1 %vm2438_vm4, %v2437_v22 }
 0xb41   : > { %2115 = vmatprep.subr.bf16.mxu1 %v2437_v22 }
 0xb44   : > { %2116 = vmatpush3.bf16.msra.mxu1 %v2274_v23 }
 0xb45   : > { %2117 = vmatprep.subr.bf16.mxu1 %v2437_v22 }
 0xb48   : > { %2118 = vmatpush3.bf16.msra.mxu1 %v2276_v4 }
 0xb49   : > { %2119 = vmatprep.subr.bf16.mxu1 %v2437_v22 }
 0xb4c   : > { %2120 = vmatpush3.bf16.msra.mxu1 %v2278_v8 }
 0xb4d   : > { %2137 = vmatprep.subr.bf16.mxu1 %v2437_v22 }
 0xc12   : > { %v2111_v27 = vpop.f32.mrb[16].mxu1 }
 0xc13   : > { %v1204_v28 = vpop.f32.mrb[17].mxu1 }
 0xc14   : > { %1245 = vrot.lane.b32.xlu0 %v1204_v28, %s2431_s18  ;;  %v2112_v29 = vpop.f32.mrb[18].mxu1 }
 0xc15   : > { %v1207_v30 = vpop.f32.mrb[19].mxu1 }
 0xc16   : > { %v2259_v31 = vpack.i.bf16 %v2111_v27, %v1207_v30 }
 0xc18   : > { %1237 = vrot.lane.b32.xlu0 %v2714_v35, %s2433_s21  ;;  %2260 = vrot.lane.b32.xlu1 %v2259_v31, %s2431_s18  ;;  %v2281_v31 = vld [vmem:[%s2979_s5] sm:$0xff]   ;;  %s2439_s18 = smov [#allocation2]  }
 0xc19   : > { %s2369_s21 = sshll.u32 %s2439_s18, 4  ;;  %s2370_s21 = int_to_ptr.vmem [resolvable:$false] %s2369_s21 }
 0xc1a   : > { %s2371_s30 = scalar_lea.vmem %s2370_s21, 768 }
 0xc86   : > { %v1246_v41 = vpop.permute.xlu0 %1245 }
 0xc87   : > { %v1261_v44 = vsel %vm1260_vm5, %v1257_v42, %v1246_v41 }
 0xc88   : > { %v1264_v35 = vpack.c.bf16 %v1261_v44, %v1261_v44  ;;  %v363_v44 = vld [vmem:[%s2550_s29 + $0x20] sm:$0xf] }
 0xc8a   : > { %v1238_v51 = vpop.permute.xlu0 %1237  ;;  %v2261_v52 = vpop.permute.xlu1 %2260  ;;  %2122 = vmatmul.mubr.msk.bf16.vlgmr.msra.gmra.mrb[20].mxu1 %vm1297_vm6, %v1264_v35  ;;  %v1449_v35 = vrot.slane %v363_v44, %v2798_v60 }
 0xc8b   : > { %v1259_v53 = vsel %vm364_vm0, %v1256_v48, %v1238_v51  ;;  %v2263_v54 = vunpack.i.h.bf16 %v2261_v52  ;;  %v2262_v55 = vunpack.i.l.bf16 %v2261_v52  ;;  %2141 = vmatprep.mubr.msk.bf16.mxu1 %vm2438_vm4, %v2437_v22  ;;  %2138 = vmatpush3.bf16.msra.mxu1 %v2281_v31  ;;  %v1454_v51 = vrot.slane %v363_v44, %v2803_v63 }
 0xc8c   : > { %2139 = vmatprep.subr.bf16.mxu1 %v2437_v22 }
 0xc8d   : > { %v1263_v59 = vsel %vm1260_vm5, %v1259_v53, %v2263_v54  ;;  %v1262_v57 = vsel %vm1260_vm5, %v1258_v56, %v2262_v55  ;;  %v1673_v54 = vrot.slane %v363_v44, %v2840_v58  ;;  %v2844_v56 = vsub.s32 3, %v2583_v36 }
 0xc8e   : > { %v1341_v61 = vpack.c.bf16 %v1263_v59, %v1262_v57  ;;  %v2283_v57 = vld [vmem:[%s2981_s7] sm:$0xff]  }
 0xc8f   : > { %2140 = vmatpush3.bf16.msra.mxu1 %v2282_v32 }
 0xc90   : > { %2134 = vmatmul.mubr.msk.bf16.vlgmr.msra.gmra.mrb[20].mxu0 %vm1297_vm6, %v1341_v61  ;;  %2165 = vmatprep.subr.bf16.mxu1 %v2437_v22 }
 0xc91   : > { %2161 = vmatprep.mubr.msk.bf16.mxu0 %vm2438_vm4, %v2437_v22 }
 0xd5d   : > { %v1335_v1 = vpop.f32.mrb[20].mxu1 }
 0xd5e   : > { %v1422_v2 = vmul.f32 %v1421_v62, %v1335_v1  ;;  %v2123_v3 = vpop.f32.mrb[21].mxu1 }
 0xd5f   : > { %v1338_v5 = vpop.f32.mrb[22].mxu1 }
 0xd60   : > { %v2806_v7 = vadd.f32 %v1422_v2, %v2553_v0  ;;  %v2124_v9 = vpop.f32.mrb[23].mxu1  ;;  %v1679_v5 = vrot.slane %v363_v44, %v2844_v56 }
 0xd62   : > { %v1433_v12 = vsel %vm364_vm0, %v2806_v7, 0.0 }
 0xd63   : > { %v1411_v13 = vpop.f32.mrb[20].mxu0  ;;  %1434 = vadd.xlane.f32.xlu0 %v1433_v12 }
 0xd64   : > { %v1428_v14 = vmul.f32 %v1427_v11, %v1411_v13  ;;  %v2135_v10 = vpop.f32.mrb[21].mxu0  ;;  %v2284_v13 = vld [vmem:[%s2980_s6] sm:$0xff]  }
 0xd65   : > { %v1414_v15 = vpop.f32.mrb[22].mxu0  ;;  %2146 = vmatpush3.bf16.msra.mxu0 %v2284_v13  ;;  %v2286_v10 = vld [vmem:[%s2980_s6 + $0x10] sm:$0xff]  }
 0xd66   : > { %v2813_v6 = vadd.f32 %v2362_v47, %v1428_v14  ;;  %v1429_v49 = vmul.f32 %v1427_v11, %v1414_v15  ;;  %v2136_v50 = vpop.f32.mrb[23].mxu0  ;;  %2147 = vmatprep.subr.bf16.mxu0 %v2437_v22  ;;  %v2285_v14 = vld [vmem:[%s2980_s6 + $0x8] sm:$0xff]   ;;  %v2287_v15 = vld [vmem:[%s2980_s6 + $0x18] sm:$0xff]   ;;  %v2288_v47 = vld [vmem:[%s2980_s6 + $0x20] sm:$0xff]  }
 0xd67   : > { %v2290_v50 = vld [vmem:[%s2980_s6 + $0x30] sm:$0xff]  }
 0xd68   : > { %v2816_v0 = vadd.f32 %v2363_v16, %v1429_v49  ;;  %v1644_v46 = vsel %vm390_vm1, %v2813_v6, 0.0  ;;  %v2289_v49 = vld [vmem:[%s2980_s6 + $0x28] sm:$0xff]   ;;  %v2291_v16 = vld [vmem:[%s2982_s8] sm:$0xff]  }
 0xd69   : > { %1645 = vadd.xlane.f32.xlu1 %v1644_v46  ;;  %2148 = vmatpush3.bf16.msra.mxu0 %v2285_v14  ;;  %v2292_v46 = vld [vmem:[%s2980_s6 + $0x38] sm:$0xff]  }
 0xd6a   : > { %v1647_v40 = vsel %vm390_vm1, %v2816_v0, 0.0  ;;  %2149 = vmatprep.subr.bf16.mxu0 %v2437_v22 }
 0xd6b   : > { %1648 = vadd.xlane.f32.xlu0 %v1647_v40  ;;  %v2293_v40 = vld [vmem:[%s2982_s8 + $0x8] sm:$0xff]  }
 0xd6d   : > { %2150 = vmatpush3.bf16.msra.mxu0 %v2286_v10 }
 0xd6e   : > { %2151 = vmatprep.subr.bf16.mxu0 %v2437_v22 }
 0xd71   : > { %2152 = vmatpush3.bf16.msra.mxu0 %v2287_v15 }
 0xd72   : > { %2153 = vmatprep.subr.bf16.mxu0 %v2437_v22 }
 0xd75   : > { %2154 = vmatpush3.bf16.msra.mxu0 %v2288_v47 }
 0xd76   : > { %2155 = vmatprep.subr.bf16.mxu0 %v2437_v22 }
 0xd79   : > { %2156 = vmatpush3.bf16.msra.mxu0 %v2289_v49 }
 0xd7a   : > { %2157 = vmatprep.subr.bf16.mxu0 %v2437_v22 }
 0xd7d   : > { %2158 = vmatpush3.bf16.msra.mxu0 %v2290_v50 }
 0xd7e   : > { %2159 = vmatprep.subr.bf16.mxu0 %v2437_v22 }
 0xd81   : > { %2160 = vmatpush3.bf16.msra.mxu0 %v2292_v46 }
 0xdf0   : > { %v1435_v17 = vpop.xlane.xlu0 %1434 }
 0xdf1   : > { %v1436_v18 = vmul.f32 0.03125, %v1435_v17  ;;  %v2294_v17 = vld [vmem:[%s2982_s8 + $0x10] sm:$0xff]  }
 0xdf3   : > { %v1437_v19 = vsub.f32 %v2806_v7, %v1436_v18  ;;  %v2295_v18 = vld [vmem:[%s2982_s8 + $0x18] sm:$0xff]  }
 0xdf5   : > { %v1438_v20 = vmul.f32 %v1437_v19, %v1437_v19 }
 0xdf6   : > { %v1646_v21 = vpop.xlane.xlu1 %1645 }
 0xdf7   : > { %v1650_v23 = vmul.f32 0.0625, %v1646_v21  ;;  %v1439_v24 = vsel %vm364_vm0, %v1438_v20, 0.0 }
 0xdf8   : > { %1440 = vadd.xlane.f32.xlu0 %v1439_v24  ;;  %v1649_v4 = vpop.xlane.xlu0 %1648 }
 0xdf9   : > { %v1652_v8 = vsub.f32 %v2813_v6, %v1650_v23  ;;  %v1651_v25 = vmul.f32 0.0625, %v1649_v4 }
 0xdfb   : > { %v1653_v26 = vsub.f32 %v2816_v0, %v1651_v25  ;;  %v1654_v27 = vmul.f32 %v1652_v8, %v1652_v8 }
 0xdfd   : > { %v1656_v28 = vsel %vm390_vm1, %v1654_v27, 0.0  ;;  %v1655_v29 = vmul.f32 %v1653_v26, %v1653_v26 }
 0xdfe   : > { %1657 = vadd.xlane.f32.xlu0 %v1656_v28 }
 0xdff   : > { %v1659_v30 = vsel %vm390_vm1, %v1655_v29, 0.0 }
 0xe00   : > { %1660 = vadd.xlane.f32.xlu1 %v1659_v30 }
 0xe85   : > { %v1441_v33 = vpop.xlane.xlu0 %1440 }
 0xe86   : > { %v1442_v34 = vmul.f32 0.03125, %v1441_v33 }
 0xe88   : > { %v1443_v37 = vadd.f32 1e-05, %v1442_v34 }
 0xe8a   : > { %2350 = vrsqrt.f32 %v1443_v37 }
 0xe8b   : > { %v1658_v38 = vpop.xlane.xlu0 %1657 }
 0xe8c   : > { %v1662_v39 = vmul.f32 0.0625, %v1658_v38 }
 0xe8d   : > { %v1661_v41 = vpop.xlane.xlu1 %1660 }
 0xe8e   : > { %v1664_v42 = vadd.f32 1e-05, %v1662_v39  ;;  %v1663_v43 = vmul.f32 0.0625, %v1661_v41 }
 0xe90   : > { %2352 = vrsqrt.f32 %v1664_v42  ;;  %v1665_v45 = vadd.f32 1e-05, %v1663_v43 }
 0xe92   : > { %2354 = vrsqrt.f32 %v1665_v45 }
 0xe94   : > { %v2351_v48 = vpop.eup %2350 }
 0xe95   : > { %v1445_v52 = vmul.f32 %v2351_v48, %v1437_v19  ;;  %v1432_v19 = vld [vmem:[%s2983_s9] sm:$0xf] }
 0xe96   : > { %v1464_v20 = vrot.slane %v1432_v19, %v2798_v60  ;;  %v1769_v46 = vrot.slane %v1432_v19, %v2844_v56 }
 0xe97   : > { %v1450_v53 = vmul.f32 %v1449_v35, %v1445_v52 }
 0xe99   : > { %v1455_v55 = vadd.f32 %v1454_v51, %v1450_v53 }
 0xe9a   : > { %v2353_v59 = vpop.eup %2352 }
 0xe9b   : > { %v1668_v61 = vmul.f32 %v2353_v59, %v1652_v8  ;;  %v1456_v62 = vpack.c.bf16 %v1455_v55, %v1455_v55 }
 0xe9c   : > { %v2355_v1 = vpop.eup %2354 }
 0xe9d   : > { %v1674_v2 = vmul.f32 %v1673_v54, %v1668_v61  ;;  %v1669_v3 = vmul.f32 %v2355_v1, %v1653_v26  ;;  %2142 = vmatmul.mubr.msk.bf16.vlgmr.msra.gmra.mrb[24].mxu1 %vm364_vm0, %v1456_v62 }
 0xe9e   : > { %2166 = vmatpush3.bf16.msra.mxu1 %v2283_v57  ;;  %2167 = vmatprep.mubr.msk.bf16.mxu1 %vm2438_vm4, %v2437_v22 }
 0xe9f   : > { %v1675_v36 = vmul.f32 %v1673_v54, %v1669_v3  ;;  %2171 = vmatprep.subr.bf16.mxu1 %v2437_v22  ;;  %v1680_v9 = vadd.f32 %v1679_v5, %v1674_v2 }
 0xea1   : > { %v1681_v11 = vadd.f32 %v1679_v5, %v1675_v36 }
 0xea3   : > { %v1682_v12 = vpack.c.bf16 %v1681_v11, %v1680_v9  ;;  %v1549_v9 = vrot.slane %v1432_v19, %v2803_v63  ;;  %v2364_v11 = vld [vmem:[%s2550_s29 + $0x18] sm:$0xff]  ;;  %s1866_s29 = sshll.u32 %s352_s11, 4  ;;  %s2923_s29 = int_to_ptr.vmem [resolvable:$true] %s1866_s29 }
 0xea4   : > { %v1841_v63 = vrot.slane %v2364_v11, %v2844_v56  ;;  %s2365_s27 = scalar_lea.vmem %s2923_s29, 384  ;;  %p2372_p0 = scmp.lt.s32.totalorder %s2923_s29, %s2370_s21 }
 0xea5   : > { %2168 = vmatmul.mubr.msk.bf16.vlgmr.msra.gmra.mrb[28].mxu1 %vm390_vm1, %v1682_v12  ;;  %v1641_v12 = vrot.slane %v2364_v11, %v2840_v58  ;;  %p2366_p11 = scmp.ne.s32.totalorder %s2923_s29, %s2365_s27  ;;  %p2373_p1 = scmp.lt.s32.totalorder %s2371_s30, %s2365_s27 }
 0xea6   : > { %2179 = vmatprep.mubr.msk.bf16.mxu1 %vm2438_vm4, %v2437_v22  ;;  %2172 = vmatpush3.bf16.msra.mxu1 %v2291_v16 }
 0xea7   : > { %2173 = vmatprep.subr.bf16.mxu1 %v2437_v22  ;;  %p2367_p12 = pnand %p2366_p11, %p2535_p5  ;;  %p2374_p2 = por %p2373_p1, %p2372_p0 }
 0xea9   : > { %p2368_p13 = pneg %p2367_p12 }
 0xeaa   : > { %2174 = vmatpush3.bf16.msra.mxu1 %v2293_v40 }
 0xeab   : > { %2175 = vmatprep.subr.bf16.mxu1 %v2437_v22  ;;  %p2375_p3 = pnand %p2374_p2, %p2368_p13 }
 0xeae   : > { %2176 = vmatpush3.bf16.msra.mxu1 %v2294_v17 }
 0xeaf   : > { %2177 = vmatprep.subr.bf16.mxu1 %v2437_v22  ;;  %v1688_v22 = vrot.slane %v1432_v19, %v2840_v58 }
 0xeb2   : > { %2178 = vmatpush3.bf16.msra.mxu1 %v2295_v18 }
 0xf70   : > { %v1514_v21 = vpop.f32.mrb[24].mxu1 }
 0xf71   : > { %v1515_v23 = vadd.f32 %v1514_v21, %v1464_v20  ;;  %v2143_v24 = vpop.f32.mrb[25].mxu1 }
 0xf72   : > { %v1517_v4 = vpop.f32.mrb[26].mxu1 }
 0xf73   : > { %v1520_v8 = vmul.f32 %v1515_v23, %v1515_v23  ;;  %v2144_v25 = vpop.f32.mrb[27].mxu1 }
 0xf75   : > { %v1521_v26 = vmul.f32 %v1520_v8, %v1515_v23 }
 0xf77   : > { %v1522_v27 = vmul.f32 0.044715, %v1521_v26 }
 0xf78   : > { %v1732_v28 = vpop.f32.mrb[28].mxu1 }
 0xf79   : > { %v1523_v29 = vadd.f32 %v1522_v27, %v1515_v23  ;;  %v1733_v30 = vadd.f32 %v1732_v28, %v1688_v22  ;;  %v2169_v31 = vpop.f32.mrb[29].mxu1 }
 0xf7a   : > { %v1735_v32 = vpop.f32.mrb[30].mxu1 }
 0xf7b   : > { %v1524_v33 = vmul.f32 0.7978846, %v1523_v29  ;;  %v1739_v34 = vmul.f32 %v1733_v30, %v1733_v30  ;;  %v1736_v37 = vadd.f32 %v1735_v32, %v1688_v22  ;;  %v2170_v38 = vpop.f32.mrb[31].mxu1 }
 0xf7d   : > { %2356 = vtanh.f32 %v1524_v33  ;;  %v1741_v60 = vmul.f32 %v1739_v34, %v1733_v30  ;;  %v1740_v39 = vmul.f32 %v1736_v37, %v1736_v37 }
 0xf7f   : > { %v1743_v41 = vmul.f32 0.044715, %v1741_v60  ;;  %v1742_v42 = vmul.f32 %v1740_v39, %v1736_v37 }
 0xf81   : > { %v1745_v43 = vadd.f32 %v1743_v41, %v1733_v30  ;;  %v1744_v44 = vmul.f32 0.044715, %v1742_v42 }
 0xf83   : > { %v1747_v45 = vmul.f32 0.7978846, %v1745_v43  ;;  %v1746_v35 = vadd.f32 %v1744_v44, %v1736_v37 }
 0xf85   : > { %2358 = vtanh.f32 %v1747_v45  ;;  %v1748_v48 = vmul.f32 0.7978846, %v1746_v35 }
 0xf87   : > { %v2357_v51 = vpop.eup %2356  ;;  %2360 = vtanh.f32 %v1748_v48 }
 0xf88   : > { %v1526_v52 = vadd.f32 1.0, %v2357_v51 }
 0xf8a   : > { %v1527_v53 = vmul.f32 0.5, %v1526_v52 }
 0xf8c   : > { %v1528_v54 = vmul.f32 %v1527_v53, %v1515_v23 }
 0xf8e   : > { %v1529_v55 = vpack.c.bf16 %v1528_v54, %v1528_v54 }
 0xf8f   : > { %v2359_v59 = vpop.eup %2358 }
 0xf90   : > { %v1751_v57 = vadd.f32 1.0, %v2359_v59  ;;  %2162 = vmatmul.mubr.bf16.vlgmr.msra.gmra.mrb[24].mxu0 %v1529_v55 }
 0xf91   : > { %v2361_v61 = vpop.eup %2360 }
 0xf92   : > { %v1753_v62 = vmul.f32 0.5, %v1751_v57  ;;  %v1752_v1 = vadd.f32 1.0, %v2361_v61 }
 0xf94   : > { %v1754_v2 = vmul.f32 0.5, %v1752_v1  ;;  %v1755_v3 = vmul.f32 %v1753_v62, %v1733_v30 }
 0xf96   : > { %v1756_v5 = vmul.f32 %v1754_v2, %v1736_v37 }
 0xf98   : > { %v1757_v36 = vpack.c.bf16 %v1756_v5, %v1755_v3 }
 0xf9a   : > { %2180 = vmatmul.mubr.msk.bf16.vlgmr.msra.gmra.mrb[32].mxu1 %vm1297_vm6, %v1757_v36 }
0x1063   : > { %v1632_v13 = vpop.f32.mrb[24].mxu0 }
0x1064   : > { %v1633_v14 = vadd.f32 %v1632_v13, %v1549_v9  ;;  %v2163_v10 = vpop.f32.mrb[25].mxu0 }
0x1065   : > { %v1635_v15 = vpop.f32.mrb[26].mxu0 }
0x1066   : > { %v1642_v47 = vmul.f32 %v1641_v12, %v1633_v14  ;;  %v2164_v49 = vpop.f32.mrb[27].mxu0 }
0x1068   : > { %v1643_v50 = vadd.f32 %v1642_v47, %v2806_v7 }
0x106a   : > { %v1846_v16 = vsel %vm364_vm0, %v1643_v50, 0.0 }
0x106b   : > { %1849 = vst [vmem:[%s352_s11] sm:$0xff] %v1846_v16 }
0x106d   : > { %v1831_v58 = vpop.f32.mrb[32].mxu1 }
0x106e   : > { %v1832_v40 = vadd.f32 %v1831_v58, %v1769_v46  ;;  %v2181_v17 = vpop.f32.mrb[33].mxu1 }
0x106f   : > { %v1834_v18 = vpop.f32.mrb[34].mxu1 }
0x1070   : > { %v1842_v20 = vmul.f32 %v1841_v63, %v1832_v40  ;;  %v1835_v21 = vadd.f32 %v1834_v18, %v1769_v46  ;;  %v2182_v23 = vpop.f32.mrb[35].mxu1 }
0x1072   : > { %v1844_v7 = vadd.f32 %v1842_v20, %v2813_v6  ;;  %v1843_v24 = vmul.f32 %v1841_v63, %v1835_v21 }
0x1074   : > { %v1847_v19 = vsel %vm390_vm1, %v1844_v7, 0.0  ;;  %v1845_v4 = vadd.f32 %v1843_v24, %v2816_v0 }
0x1075   : > { %1850 = vst [vmem:[%s352_s11 + $0x8] sm:$0xff] %v1847_v19 }
0x1076   : > { %v1848_v56 = vsel %vm390_vm1, %v1845_v4, 0.0 }
0x1077   : > { %1851 = vst [vmem:[%s352_s11 + $0x10] sm:$0xff] %v1848_v56 }
0x1078   : > { %2378 = shalt.err (!%p2375_p3)
}
0x1079   : > { %s2379_s28 = scalar_lea.hbm %s2928_s26, 384  ;;  %s2383_s20 = scalar_lea.hbm %s2984_s10, 768 }
0x107a   : > { %p2380_p4 = scmp.ne.s32.totalorder %s2928_s26, %s2379_s28  ;;  %p2384_p9 = scmp.lt.u32.totalorder %s2928_s26, %s2984_s10 }
0x107b   : > { %p2385_p10 = scmp.lt.u32.totalorder %s2383_s20, %s2379_s28  ;;  %p2387_p12 = scmp.lt.u32.totalorder %s2379_s28, %s2928_s26 }
0x107c   : > { %p2381_p7 = pnand %p2380_p4, %p2535_p5 }
0x107d   : > { %p2386_p11 = por %p2385_p10, %p2384_p9 }
0x107e   : > { %p2382_p8 = pneg %p2381_p7 }
0x107f   : > { %p2388_p13 = por %p2387_p12, %p2386_p11 }
0x1081   : > { %p2389_p0 = pnand %p2388_p13, %p2382_p8 }
0x1083   : > { %2392 = shalt.err (!%p2389_p0)
}
0x1084   : > { %s2440_s27 = smov 128   ;;  %s2441_s21 = smov 8  }
0x1085   : > { %2198 = dma.vmem_to_hbm [thread:$0]  (%p2535_p5), %s2923_s29, 384, %s2928_s26, %s2933_s17, %s2440_s27, %s2440_s27, %s2441_s21  }
0x1086 PF: > { %p2204_p1 = scmp.ge.s32.totalorder %s2427_s16, 2  ;;  %s1881_s30 = sand.u32 1, %s2415_s13  }
0x1087   : > { %s1882_s28 = scalar_lea.sflag [#allocation3], %s1881_s30 }
0x1088   : > { %p2201_p2 = pnand %p2204_p1, %p2539_p6 }
0x108a   : > { %2410 = dma.done.wait (!%p2201_p2), %s1882_s28, 384  }
0x108b   : > { %2412 = vsyncadd (!%p2201_p2), %s1882_s28, 4294966912  ;;  %p20_p3 = scmp.ge.s32.totalorder %s2522_s19, 4   ;;  %s2987_s13 = smov %s2419_s14 }
0x108c   : > { %s2988_s14 = smov %s2423_s15  ;;  %s2989_s15 = smov %s2533_s22 }
0x108d   : > { %s2990_s16 = smov %s2522_s19  ;;  %22 = sbr.rel (!%p20_p3) target bundleno = 3 (0x3), region = 95 }
0x1094   :  { %1887 = vsyncpa [#allocation3], 1 }
0x1095   :  { %1889 = vsyncpa [#allocation3 + $0x1], 1 }

</bundles_post_ra>
